<compile_context>
chip_gen: v6e
topology: v6e:2x2x1
jax: 0.10.0
libtpu: 0.0.40
codegen_flags: <defaults>
</compile_context>

<pallas_src>
import jax
import jax.numpy as jnp
from jax.experimental import pallas as pl
from jax.experimental.pallas import tpu as pltpu


def _scale_bias_kernel(wb_ref, x_ref, o_ref):
    # wb_ref: SMEM scalar params [weight, bias] (f32)
    # x_ref / o_ref: VMEM tiles of the flattened input / output
    w = wb_ref[0]
    b = wb_ref[1]
    o_ref[...] = (x_ref[...] * w + b).astype(o_ref.dtype)


_TARGET_BLOCK_ELEMS = 2 * 1024 * 1024   # 2M elems -> 8 MiB per f32 block
_MIN_PALLAS_BYTES = 256 * 1024          # below this, fused XLA mul-add wins
_VMEM_LIMIT_BYTES = 48 << 20            # 2x(in+out) 8 MiB buffers = 32 MiB + headroom
                                        # (<= v7x 64 MiB physical, safe on v5e/v6e)


def _run_pallas(wb, x_flat, total, dtype):
    """Pipelined 1-D grid over lane-dense blocks; ragged last block is masked."""
    # Lane-dense layout: prefer 1024 lanes, fall back to 128.
    lanes = 1024 if total % 1024 == 0 else 128
    pad = (-total) % lanes
    if pad:
        # At most lanes-1 elements; only triggers when total isn't lane-divisible.
        x_flat = jnp.pad(x_flat, (0, pad))
    rows = (total + pad) // lanes
    x2d = x_flat.reshape(rows, lanes)

    # Block rows: up to ~8 MiB (f32) per block, but aim for >= 4 grid steps so
    # mid-size inputs still get load/compute/store overlap.
    desired = min(_TARGET_BLOCK_ELEMS // lanes, pl.cdiv(rows, 4))
    tile_rows = max(8, (desired // 8) * 8)      # keep sublane-divisible
    if tile_rows >= rows:
        tile_rows = rows                        # single full-extent block (legal)
    grid = (pl.cdiv(rows, tile_rows),)

    out = pl.pallas_call(
        _scale_bias_kernel,
        out_shape=jax.ShapeDtypeStruct((rows, lanes), dtype),
        grid=grid,
        in_specs=[
            pl.BlockSpec(memory_space=pltpu.MemorySpace.SMEM),   # [w, b] scalars
            pl.BlockSpec((tile_rows, lanes), lambda i: (i, 0)),
        ],
        out_specs=pl.BlockSpec((tile_rows, lanes), lambda i: (i, 0)),
        compiler_params=pltpu.CompilerParams(
            dimension_semantics=("parallel",),   # megacore sharding on v7x
            vmem_limit_bytes=_VMEM_LIMIT_BYTES),
    )(wb, x2d)

    out_flat = out.reshape(-1)
    if pad:
        out_flat = out_flat[:total]
    return out_flat


def simplest_model_forward(x_nchw, weight, bias):
    """Equivalent of SimplestModel.forward (torch.nn.Conv2d(1, 1, 1)).

    x_nchw: [N, 1, H, W]
    weight: [1, 1, 1, 1]  (PyTorch conv weight shape)
    bias:   [1]
    """
    n, c, h, w = x_nchw.shape
    assert c == 1, "SimplestModel has a single input channel"
    total = n * c * h * w
    dtype = x_nchw.dtype

    w_s = weight.reshape(()).astype(jnp.float32)
    b_s = bias.reshape(()).astype(jnp.float32)

    if total * jnp.dtype(dtype).itemsize < _MIN_PALLAS_BYTES:
        # Dispatch + DMA setup dominates at this size; XLA's fused elementwise
        # multiply-add hits the same HBM roofline with lower fixed overhead.
        return (x_nchw * w_s + b_s).astype(dtype)

    wb = jnp.stack([w_s, b_s])
    out_flat = _run_pallas(wb, x_nchw.reshape(-1), total, dtype)
    return out_flat.reshape(n, c, h, w)


if __name__ == "__main__":
    key = jax.random.PRNGKey(0)
    kx, kw, kb, kx2, kx3 = jax.random.split(key, 5)

    # Deterministic parameters (Conv2d(1, 1, 1): weight [1,1,1,1], bias [1])
    weight = jax.random.normal(kw, (1, 1, 1, 1), dtype=jnp.float32)
    bias = jax.random.normal(kb, (1,), dtype=jnp.float32)

    def ref(x):
        return x * weight.reshape(()) + bias.reshape(())

    # 1) Module's nominal INPUT_SIZE = [1, 1, 32, 32]  (tiny -> fused XLA path)
    x_small = jax.random.normal(kx, (1, 1, 32, 32), dtype=jnp.float32)
    y_small = jax.block_until_ready(simplest_model_forward(x_small, weight, bias))
    assert y_small.shape == (1, 1, 32, 32)
    assert jnp.allclose(y_small, ref(x_small), atol=1e-6), "mismatch (tiny path)"

    # 2) 4 MiB input -> Pallas tiled path, 4 pipelined lane-dense blocks
    x_big = jax.random.normal(kx2, (1, 1, 1024, 1024), dtype=jnp.float32)
    y_big = jax.block_until_ready(simplest_model_forward(x_big, weight, bias))
    assert y_big.shape == (1, 1, 1024, 1024)
    assert jnp.allclose(y_big, ref(x_big), atol=1e-6), "mismatch (tiled path)"

    # 3) Ragged size (total not a multiple of 128) -> lane pad + masked last block
    x_rag = jax.random.normal(kx3, (1, 1, 517, 253), dtype=jnp.float32)
    y_rag = jax.block_until_ready(simplest_model_forward(x_rag, weight, bias))
    assert y_rag.shape == (1, 1, 517, 253)
    assert jnp.allclose(y_rag, ref(x_rag), atol=1e-6), "mismatch (ragged path)"

    print("KERNEL_OK")
</pallas_src>

<mosaic_0001>
module attributes {stable_mosaic.version = 11 : i64} {
  func.func @_scale_bias_kernel(%arg0: i32, %arg1: memref<2xf32, #tpu.memory_space<smem>>, %arg2: memref<256x1024xf32, #tpu.memory_space<vmem>>, %arg3: memref<256x1024xf32, #tpu.memory_space<vmem>>) attributes {dimension_semantics = [#tpu.dimension_semantics<parallel>], iteration_bounds = array<i64: 4>, scalar_prefetch = 0 : i64, scratch_operands = 0 : i64, tpu.core_type = #tpu.core_type<tc>, window_params = [{transform_indices = @transform_0, window_bounds = array<i64: 2>}, {transform_indices = @transform_1, window_bounds = array<i64: 256, 1024>}, {transform_indices = @transform_2, window_bounds = array<i64: 256, 1024>}]} {
    %c0 = arith.constant 0 : index
    %0 = memref.load %arg1[%c0] : memref<2xf32, #tpu.memory_space<smem>>
    %c1 = arith.constant 1 : index
    %1 = memref.load %arg1[%c1] : memref<2xf32, #tpu.memory_space<smem>>
    %c0_0 = arith.constant 0 : index
    %c0_1 = arith.constant 0 : index
    %2 = vector.load %arg2[%c0_0, %c0_1] : memref<256x1024xf32, #tpu.memory_space<vmem>>, vector<256x1024xf32>
    %3 = vector.broadcast %0 : f32 to vector<256x1024xf32>
    %4 = arith.mulf %2, %3 : vector<256x1024xf32>
    %5 = vector.broadcast %1 : f32 to vector<256x1024xf32>
    %6 = arith.addf %4, %5 : vector<256x1024xf32>
    %c0_2 = arith.constant 0 : index
    %c0_3 = arith.constant 0 : index
    %7 = vector.load %arg3[%c0_2, %c0_3] : memref<256x1024xf32, #tpu.memory_space<vmem>>, vector<256x1024xf32>
    tpu.vector_store %arg3[%c0_2, %c0_3], %6 {strides = array<i32>} : memref<256x1024xf32, #tpu.memory_space<vmem>>, vector<256x1024xf32>,
    return
  }
  func.func @transform_0(%arg0: i32) -> i32 {
    %c0_i32 = arith.constant 0 : i32
    %c0_i32_0 = arith.constant 0 : i32
    return %c0_i32 : i32
  }
  func.func @transform_1(%arg0: i32) -> (i32, i32) {
    %c0_i32 = arith.constant 0 : i32
    %c0_i32_0 = arith.constant 0 : i32
    return %arg0, %c0_i32 : i32, i32
  }
  func.func @transform_2(%arg0: i32) -> (i32, i32) {
    %c0_i32 = arith.constant 0 : i32
    %c0_i32_0 = arith.constant 0 : i32
    return %arg0, %c0_i32 : i32, i32
  }
}

</mosaic_0001>

<bundles_post_ra>
// kernel: tpu_custom_call.1
= control target key start
LH: loop header
LB: loop body
LE: loop exit
PB: predicated region body
PF: predicated region fallthrough
CT: control target
= control target key end

     0   :  { %7 = vsyncpa [#allocation5], 0  ;;  %s2728_s0 = inlined_call_operand.hbm [shape: f32[2], index: 0, kind: input, shape index: {}]   ;;  %s2729_s1 = inlined_call_operand.hbm [shape: f32[1024,1024], index: 1, kind: input, shape index: {}]   ;;  %s2730_s2 = inlined_call_operand.hbm [shape: f32[1024,1024], index: 2, kind: output, shape index: {}]  }
   0x1   :  { %8 = vsyncpa [#allocation3], 0 }
   0x2   :  { %10 = vsyncpa [#allocation3 + $0x1], 0 }
   0x3   :  { %11 = vsyncpa [#allocation4], 0 }
   0x4   :  { %13 = vsyncpa [#allocation4 + $0x1], 0  ;;  %s1520_s9 = smov 0   ;;  %s1522_s10 = smov 0  }
   0x5   :  { %s1524_s11 = smov 0   ;;  %s1526_s12 = smov 0  }
   0x6 LB: > { %s1541_s13 = sadd.s32 4294967295, %s1496_s12   ;;  %s1305_s14 = sadd.s32 4294967294, %s1496_s12   ;;  %s1496_s12 = sphi %s1526_s12, %s2750_s12   ;;  %s1492_s11 = sphi %s1524_s11, %s2749_s11   ;;  %s1488_s10 = sphi %s1522_s10, %s2748_s10   ;;  %s1484_s9 = sphi %s1520_s9, %s2747_s9  }
   0x7   : > { %s1545_s15 = sadd.s32 1, %s1496_s12   ;;  %s47_s16 = sadd.s32 1, %s1492_s11 }
   0x8   : > { %s44_s17 = ssub.s32 %s1496_s12, %s1545_s15  ;;  %p54_p0 = scmp.ne.s32.totalorder %s1492_s11, %s1488_s10 }
   0x9   : > { %p45_p1 = scmp.eq.s32.totalorder %s44_s17, 0  ;;  %p55_p2 = scmp.eq.s32.totalorder %s1496_s12, 0 }
   0xa   : > { %p60_p3 = scmp.ne.s32.totalorder %s1488_s10, %s1484_s9  ;;  %p2732_p4 = scmp.eq.s32.totalorder %s1541_s13, 0 }
   0xb   : > { %s1557_s18 = scalar_select %p45_p1, %s1492_s11, %s47_s16  }
   0xc   : > { %p1559_p5 = por %p55_p2, %p54_p0  ;;  %p1565_p6 = por %p2732_p4, %p60_p3 }
   0xd   : > { %p84_p7 = scmp.eq.s32.totalorder %s1541_s13, 3  ;;  %p90_p8 = scmp.eq.s32.totalorder %s1305_s14, 3 }
   0xe   : > { %s2736_s20 = scalar_select %p1565_p6, 1, 0 }
   0xf   : > { %p1306_p9 = scmp.ge.s32.totalorder %s1496_s12, 1  ;;  %p97_p10 = scmp.lt.s32.totalorder %s1496_s12, 5 }
  0x10   : > { %p1572_p11 = por %p84_p7, %p54_p0  ;;  %p1576_p12 = por %p90_p8, %p60_p3 }
  0x11   : > { %p1580_p13 = pnand %p1306_p9, %p97_p10  ;;  %p1349_p2 = scmp.lt.s32.totalorder %s1496_s12, 4 }
  0x12   : > { %s2737_s21 = scalar_select %p1572_p11, 1, 0 }
  0x13   : > { %s2738_s22 = scalar_select %p1576_p12, 1, 0 }
  0x14   : > { %s2739_s23 = scalar_select %p1580_p13, 1, 0 }
  0x15   : > { %p1336_p1 = pneg %p1580_p13  ;;  %s119_s24 = sand.u32 1, %s1492_s11  }
  0x16   : > { %s1325_s25 = sshll.u32 %s1496_s12, 15  ;;  %p1593_p0 = pnand %p1349_p2, %p1559_p5 }
  0x17   : > { %p1337_p6 = pnand %p1336_p1, %p2732_p4  ;;  %s1309_s27 = sshll.u32 %s119_s24, 11 }
  0x18   : > { %s1498_s28 = smov [#allocation2]   ;;  %s1603_s5 = scalar_lea.hbm %s2729_s1, %s1325_s25 }
  0x19   : > { %1339 = dma.hbm_to_smem (!%p1337_p6), %s2728_s0, 16, %s1498_s28, [#allocation5]  }
  0x1a   : > { %s123_s6 = scalar_lea.vmem [#allocation6], %s1309_s27  ;;  %s1607_s8 = scalar_lea.sflag [#allocation3], %s119_s24 }
  0x1b   : > { %s131_s7 = sshll.u32 %s123_s6, 4  ;;  %s1400_s14 = scalar_lea.hbm %s1603_s5, 32768  ;;  %s1605_s7 = int_to_ptr.vmem [resolvable:$true] %s131_s7 }
  0x1c   : > { %p1401_p3 = scmp.ne.s32.totalorder %s1603_s5, %s1400_s14  ;;  %p1402_p5 = pneg %p1593_p0 }
  0x1d   : > { %s1405_s19 = scalar_lea.hbm %s2729_s1, 131072  ;;  %p1406_p8 = scmp.lt.s32.totalorder %s1603_s5, %s2729_s1 }
  0x1e   : > { %p1403_p7 = pnand %p1402_p5, %p1401_p3  ;;  %p1407_p9 = scmp.lt.s32.totalorder %s1405_s19, %s1400_s14 }
  0x20   : > { %p1404_p6 = pneg %p1403_p7  ;;  %p1408_p10 = por %p1407_p9, %p1406_p8 }
  0x22   : > { %p1409_p1 = pnand %p1408_p10, %p1404_p6 }
  0x24   : > { %1412 = shalt.err (!%p1409_p1)
}
  0x25   : > { %s1413_s24 = scalar_lea.vmem %s1605_s7, 32768  ;;  %s1499_s27 = smov [#allocation6]  }
  0x26   : > { %p1414_p2 = scmp.ne.s32.totalorder %s1605_s7, %s1413_s24  ;;  %s1418_s29 = sshll.u32 %s1499_s27, 4  ;;  %s1419_s29 = int_to_ptr.vmem [resolvable:$false] %s1418_s29 }
  0x27   : > { %s1420_s30 = scalar_lea.vmem %s1419_s29, 65536  ;;  %p1421_p7 = scmp.lt.s32.totalorder %s1605_s7, %s1419_s29 }
  0x28   : > { %p1416_p4 = pnand %p1414_p2, %p1402_p5  ;;  %p1422_p12 = scmp.lt.s32.totalorder %s1420_s30, %s1413_s24 }
  0x2a   : > { %p1417_p3 = pneg %p1416_p4  ;;  %p1423_p11 = por %p1422_p12, %p1421_p7 }
  0x2c   : > { %p1424_p13 = pnand %p1423_p11, %p1417_p3 }
  0x2e   : > { %1427 = shalt.err (!%p1424_p13)
}
  0x2f   : > { %s1500_s3 = smov 1024   ;;  %s1501_s4 = smov 64  }
  0x30   : > { %1343 = dma.hbm_to_vmem [thread:$0]  (!%p1593_p0), %s1603_s5, 32768, %s1605_s7, %s1607_s8, %s1500_s3, %s1500_s3, %s1501_s4  }
  0x31   : > { %p2741_p5 = scmp.ne.s32.totalorder %s2739_s23, 0 }
  0x32   : > { %p2742_p4 = scmp.eq.s32.totalorder (!%p2741_p5), %s1541_s13, 0 }
  0x33   : > { %143 = sbr.rel (%p2741_p5) target bundleno = 245 (0xf5), region = 28 }
  0x38   : > { %1471 = dma.done.wait (%p2742_p4), [#allocation5], 16   ;;  %p2743_p6 = pmov %p2742_p4 }
  0x39   : > { %s1635_s6 = sand.u32 1, %s1488_s10   ;;  %p2744_p11 = scmp.ne.s32.totalorder %s2736_s20, 0 }
  0x3a   : > { %1473 = vsyncadd (%p2743_p6), [#allocation5], 4294967280  ;;  %s1315_s14 = sshll.u32 %s1635_s6, 11  ;;  %s150_s16 = scalar_lea.sflag [#allocation3], %s1635_s6 }
  0x3b   : > { %s1641_s26 = scalar_lea.vmem [#allocation6], %s1315_s14 }
  0x3c   : > { %1475 = dma.done.wait (%p2744_p11), %s150_s16, 32768  }
  0x3d   : > { %1477 = vsyncadd (%p2744_p11), %s150_s16, 4294934528 }
  0x3e   : > { %158 = sfence }
  0x3f   : > { %s177_s23 = sld [smem:[#allocation2]]  ;;  %v179_v0 = vld [vmem:[%s1641_s26] sm:$0xff]  ;;  %v180_v1 = vld [vmem:[%s1641_s26 + $0x8] sm:$0xff]  ;;  %v181_v2 = vld [vmem:[%s1641_s26 + $0x10] sm:$0xff]  ;;  %s1684_s20 = scalar_lea.vmem [#allocation7], %s1315_s14 }
  0x40   : > { %s1317_s5 = sld [smem:[#allocation2 + $0x1]]  ;;  %v182_v3 = vld [vmem:[%s1641_s26 + $0x18] sm:$0xff]  ;;  %v183_v4 = vld [vmem:[%s1641_s26 + $0x20] sm:$0xff]  ;;  %v184_v5 = vld [vmem:[%s1641_s26 + $0x28] sm:$0xff]  ;;  %s1327_s7 = sshll.u32 %s1541_s13, 15 }
  0x41   : > { %v185_v6 = vld [vmem:[%s1641_s26 + $0x30] sm:$0xff]  ;;  %v186_v8 = vld [vmem:[%s1641_s26 + $0x38] sm:$0xff]  ;;  %v187_v13 = vld [vmem:[%s1641_s26 + $0x40] sm:$0xff]  ;;  %s1220_s8 = sshll.u32 %s1684_s20, 4  ;;  %s2675_s19 = scalar_lea.hbm %s2730_s2, %s1327_s7  ;;  %s2677_s8 = int_to_ptr.vmem [resolvable:$true] %s1220_s8 }
  0x42   : > { %v188_v18 = vld [vmem:[%s1641_s26 + $0x48] sm:$0xff]  ;;  %v189_v19 = vld [vmem:[%s1641_s26 + $0x50] sm:$0xff]  ;;  %v190_v20 = vld [vmem:[%s1641_s26 + $0x58] sm:$0xff]  ;;  %s1206_s25 = scalar_lea.sflag [#allocation4], %s1635_s6  ;;  %s1428_s28 = scalar_lea.vmem %s2677_s8, 32768 }
  0x43   : > { %v191_v25 = vld [vmem:[%s1641_s26 + $0x60] sm:$0xff]  ;;  %v192_v26 = vld [vmem:[%s1641_s26 + $0x68] sm:$0xff]  ;;  %v193_v27 = vld [vmem:[%s1641_s26 + $0x70] sm:$0xff]  ;;  %p1429_p12 = scmp.ne.s32.totalorder %s2677_s8, %s1428_s28  ;;  %p2745_p13 = scmp.ne.s32.totalorder %s2737_s21, 0 }
  0x44   : > { %v194_v32 = vld [vmem:[%s1641_s26 + $0x78] sm:$0xff]  ;;  %v195_v37 = vld [vmem:[%s1641_s26 + $0x80] sm:$0xff]  ;;  %v196_v42 = vld [vmem:[%s1641_s26 + $0x88] sm:$0xff]  ;;  %s1502_s24 = smov [#allocation7]  }
  0x45   : > { %v1654_v7 = vstv %s177_s23  ;;  %v197_v43 = vld [vmem:[%s1641_s26 + $0x90] sm:$0xff]  ;;  %v198_v44 = vld [vmem:[%s1641_s26 + $0x98] sm:$0xff]  ;;  %v199_v49 = vld [vmem:[%s1641_s26 + $0xa0] sm:$0xff]  ;;  %p1430_p0 = pnand %p1429_p12, %p2745_p13  ;;  %s1432_s27 = sshll.u32 %s1502_s24, 4  ;;  %s1433_s27 = int_to_ptr.vmem [resolvable:$false] %s1432_s27 }
  0x46   : > { %v436_v9 = vmul.f32 %v1654_v7, %v179_v0  ;;  %v1658_v10 = vstv %s1317_s5  ;;  %v437_v11 = vmul.f32 %v1654_v7, %v180_v1  ;;  %v438_v12 = vmul.f32 %v1654_v7, %v181_v2  ;;  %v200_v50 = vld [vmem:[%s1641_s26 + $0xa8] sm:$0xff]  ;;  %v201_v51 = vld [vmem:[%s1641_s26 + $0xb0] sm:$0xff]  ;;  %v202_v56 = vld [vmem:[%s1641_s26 + $0xb8] sm:$0xff]  ;;  %s1434_s29 = scalar_lea.vmem %s1433_s27, 65536  ;;  %p1435_p9 = scmp.lt.s32.totalorder %s2677_s8, %s1433_s27 }
  0x47   : > { %v439_v14 = vmul.f32 %v1654_v7, %v182_v3  ;;  %v440_v15 = vmul.f32 %v1654_v7, %v183_v4  ;;  %v441_v16 = vmul.f32 %v1654_v7, %v184_v5  ;;  %v442_v17 = vmul.f32 %v1654_v7, %v185_v6  ;;  %v203_v61 = vld [vmem:[%s1641_s26 + $0xc0] sm:$0xff]  ;;  %v204_v2 = vld [vmem:[%s1641_s26 + $0xc8] sm:$0xff]  ;;  %v205_v3 = vld [vmem:[%s1641_s26 + $0xd0] sm:$0xff]  ;;  %p1431_p8 = pneg %p1430_p0  ;;  %p1436_p10 = scmp.lt.s32.totalorder %s1434_s29, %s1428_s28 }
  0x48   : > { %v693_v21 = vadd.f32 %v1658_v10, %v436_v9  ;;  %v694_v22 = vadd.f32 %v1658_v10, %v437_v11  ;;  %v695_v23 = vadd.f32 %v1658_v10, %v438_v12  ;;  %v443_v24 = vmul.f32 %v1654_v7, %v186_v8  ;;  %v206_v4 = vld [vmem:[%s1641_s26 + $0xd8] sm:$0xff]  ;;  %v207_v11 = vld [vmem:[%s1641_s26 + $0xe0] sm:$0xff]  ;;  %v208_v12 = vld [vmem:[%s1641_s26 + $0xe8] sm:$0xff] }
  0x49   : > { %v696_v28 = vadd.f32 %v1658_v10, %v439_v14  ;;  %v697_v29 = vadd.f32 %v1658_v10, %v440_v15  ;;  %v698_v30 = vadd.f32 %v1658_v10, %v441_v16  ;;  %v699_v31 = vadd.f32 %v1658_v10, %v442_v17  ;;  %p1437_p1 = por %p1436_p10, %p1435_p9 }
  0x4a   : > { %949 = vst [vmem:[%s1684_s20] sm:$0xff] %v693_v21  ;;  %950 = vst [vmem:[%s1684_s20 + $0x8] sm:$0xff] %v694_v22  ;;  %v700_v33 = vadd.f32 %v1658_v10, %v443_v24  ;;  %v444_v34 = vmul.f32 %v1654_v7, %v187_v13  ;;  %v445_v35 = vmul.f32 %v1654_v7, %v188_v18  ;;  %v209_v13 = vld [vmem:[%s1641_s26 + $0xf0] sm:$0xff]  ;;  %v210_v18 = vld [vmem:[%s1641_s26 + $0xf8] sm:$0xff] }
  0x4b   : > { %951 = vst [vmem:[%s1684_s20 + $0x10] sm:$0xff] %v695_v23  ;;  %v446_v36 = vmul.f32 %v1654_v7, %v189_v19  ;;  %952 = vst [vmem:[%s1684_s20 + $0x18] sm:$0xff] %v696_v28  ;;  %v447_v38 = vmul.f32 %v1654_v7, %v190_v20  ;;  %v448_v39 = vmul.f32 %v1654_v7, %v191_v25  ;;  %v211_v23 = vld [vmem:[%s1641_s26 + $0x100] sm:$0xff]  ;;  %v212_v28 = vld [vmem:[%s1641_s26 + $0x108] sm:$0xff]  ;;  %p1438_p2 = pnand %p1437_p1, %p1431_p8 }
  0x4c   : > { %953 = vst [vmem:[%s1684_s20 + $0x20] sm:$0xff] %v697_v29  ;;  %954 = vst [vmem:[%s1684_s20 + $0x28] sm:$0xff] %v698_v30  ;;  %v449_v40 = vmul.f32 %v1654_v7, %v192_v26  ;;  %v450_v41 = vmul.f32 %v1654_v7, %v193_v27  ;;  %v701_v45 = vadd.f32 %v1658_v10, %v444_v34  ;;  %v213_v29 = vld [vmem:[%s1641_s26 + $0x110] sm:$0xff]  ;;  %v214_v30 = vld [vmem:[%s1641_s26 + $0x118] sm:$0xff] }
  0x4d   : > { %955 = vst [vmem:[%s1684_s20 + $0x30] sm:$0xff] %v699_v31  ;;  %956 = vst [vmem:[%s1684_s20 + $0x38] sm:$0xff] %v700_v33  ;;  %v702_v46 = vadd.f32 %v1658_v10, %v445_v35  ;;  %v703_v47 = vadd.f32 %v1658_v10, %v446_v36  ;;  %v451_v48 = vmul.f32 %v1654_v7, %v194_v32  ;;  %v215_v35 = vld [vmem:[%s1641_s26 + $0x120] sm:$0xff]  ;;  %v216_v36 = vld [vmem:[%s1641_s26 + $0x128] sm:$0xff] }
  0x4e   : > { %v704_v52 = vadd.f32 %v1658_v10, %v447_v38  ;;  %v705_v53 = vadd.f32 %v1658_v10, %v448_v39  ;;  %v706_v54 = vadd.f32 %v1658_v10, %v449_v40  ;;  %v707_v55 = vadd.f32 %v1658_v10, %v450_v41  ;;  %957 = vst [vmem:[%s1684_s20 + $0x40] sm:$0xff] %v701_v45 }
  0x4f   : > { %958 = vst [vmem:[%s1684_s20 + $0x48] sm:$0xff] %v702_v46  ;;  %959 = vst [vmem:[%s1684_s20 + $0x50] sm:$0xff] %v703_v47  ;;  %v708_v57 = vadd.f32 %v1658_v10, %v451_v48  ;;  %v452_v58 = vmul.f32 %v1654_v7, %v195_v37  ;;  %v453_v59 = vmul.f32 %v1654_v7, %v196_v42  ;;  %v217_v37 = vld [vmem:[%s1641_s26 + $0x130] sm:$0xff]  ;;  %v218_v42 = vld [vmem:[%s1641_s26 + $0x138] sm:$0xff] }
  0x50   : > { %v454_v60 = vmul.f32 %v1654_v7, %v197_v43  ;;  %960 = vst [vmem:[%s1684_s20 + $0x58] sm:$0xff] %v704_v52  ;;  %961 = vst [vmem:[%s1684_s20 + $0x60] sm:$0xff] %v705_v53  ;;  %v455_v62 = vmul.f32 %v1654_v7, %v198_v44  ;;  %v456_v63 = vmul.f32 %v1654_v7, %v199_v49  ;;  %v219_v47 = vld [vmem:[%s1641_s26 + $0x140] sm:$0xff]  ;;  %v220_v52 = vld [vmem:[%s1641_s26 + $0x148] sm:$0xff] }
  0x51   : > { %962 = vst [vmem:[%s1684_s20 + $0x68] sm:$0xff] %v706_v54  ;;  %963 = vst [vmem:[%s1684_s20 + $0x70] sm:$0xff] %v707_v55  ;;  %v457_v0 = vmul.f32 %v1654_v7, %v200_v50  ;;  %v458_v1 = vmul.f32 %v1654_v7, %v201_v51  ;;  %v709_v5 = vadd.f32 %v1658_v10, %v452_v58  ;;  %v221_v53 = vld [vmem:[%s1641_s26 + $0x150] sm:$0xff]  ;;  %v222_v54 = vld [vmem:[%s1641_s26 + $0x158] sm:$0xff] }
  0x52   : > { %964 = vst [vmem:[%s1684_s20 + $0x78] sm:$0xff] %v708_v57  ;;  %v710_v6 = vadd.f32 %v1658_v10, %v453_v59  ;;  %v711_v8 = vadd.f32 %v1658_v10, %v454_v60  ;;  %v459_v9 = vmul.f32 %v1654_v7, %v202_v56  ;;  %v712_v14 = vadd.f32 %v1658_v10, %v455_v62  ;;  %v223_v59 = vld [vmem:[%s1641_s26 + $0x160] sm:$0xff]  ;;  %v224_v60 = vld [vmem:[%s1641_s26 + $0x168] sm:$0xff] }
  0x53   : > { %v713_v15 = vadd.f32 %v1658_v10, %v456_v63  ;;  %v714_v16 = vadd.f32 %v1658_v10, %v457_v0  ;;  %v715_v17 = vadd.f32 %v1658_v10, %v458_v1  ;;  %965 = vst [vmem:[%s1684_s20 + $0x80] sm:$0xff] %v709_v5  ;;  %v460_v20 = vmul.f32 %v1654_v7, %v203_v61  ;;  %v225_v61 = vld [vmem:[%s1641_s26 + $0x170] sm:$0xff] }
  0x54   : > { %966 = vst [vmem:[%s1684_s20 + $0x88] sm:$0xff] %v710_v6  ;;  %967 = vst [vmem:[%s1684_s20 + $0x90] sm:$0xff] %v711_v8  ;;  %v716_v19 = vadd.f32 %v1658_v10, %v459_v9  ;;  %v461_v21 = vmul.f32 %v1654_v7, %v204_v2  ;;  %v462_v22 = vmul.f32 %v1654_v7, %v205_v3  ;;  %v226_v2 = vld [vmem:[%s1641_s26 + $0x178] sm:$0xff]  ;;  %v227_v8 = vld [vmem:[%s1641_s26 + $0x180] sm:$0xff] }
  0x55   : > { %968 = vst [vmem:[%s1684_s20 + $0x98] sm:$0xff] %v712_v14  ;;  %969 = vst [vmem:[%s1684_s20 + $0xa0] sm:$0xff] %v713_v15  ;;  %v463_v24 = vmul.f32 %v1654_v7, %v206_v4  ;;  %v464_v25 = vmul.f32 %v1654_v7, %v207_v11  ;;  %v465_v26 = vmul.f32 %v1654_v7, %v208_v12  ;;  %v228_v14 = vld [vmem:[%s1641_s26 + $0x188] sm:$0xff]  ;;  %v229_v15 = vld [vmem:[%s1641_s26 + $0x190] sm:$0xff] }
  0x56   : > { %970 = vst [vmem:[%s1684_s20 + $0xa8] sm:$0xff] %v714_v16  ;;  %971 = vst [vmem:[%s1684_s20 + $0xb0] sm:$0xff] %v715_v17  ;;  %v466_v27 = vmul.f32 %v1654_v7, %v209_v13  ;;  %v717_v31 = vadd.f32 %v1658_v10, %v460_v20  ;;  %v718_v32 = vadd.f32 %v1658_v10, %v461_v21  ;;  %v230_v16 = vld [vmem:[%s1641_s26 + $0x198] sm:$0xff]  ;;  %v231_v21 = vld [vmem:[%s1641_s26 + $0x1a0] sm:$0xff] }
  0x57   : > { %972 = vst [vmem:[%s1684_s20 + $0xb8] sm:$0xff] %v716_v19  ;;  %v719_v33 = vadd.f32 %v1658_v10, %v462_v22  ;;  %v467_v34 = vmul.f32 %v1654_v7, %v210_v18  ;;  %v720_v38 = vadd.f32 %v1658_v10, %v463_v24  ;;  %v721_v39 = vadd.f32 %v1658_v10, %v464_v25  ;;  %v232_v22 = vld [vmem:[%s1641_s26 + $0x1a8] sm:$0xff] }
  0x58   : > { %v722_v40 = vadd.f32 %v1658_v10, %v465_v26  ;;  %v723_v41 = vadd.f32 %v1658_v10, %v466_v27  ;;  %973 = vst [vmem:[%s1684_s20 + $0xc0] sm:$0xff] %v717_v31  ;;  %974 = vst [vmem:[%s1684_s20 + $0xc8] sm:$0xff] %v718_v32  ;;  %v468_v44 = vmul.f32 %v1654_v7, %v211_v23  ;;  %v233_v23 = vld [vmem:[%s1641_s26 + $0x1b0] sm:$0xff] }
  0x59   : > { %975 = vst [vmem:[%s1684_s20 + $0xd0] sm:$0xff] %v719_v33  ;;  %v724_v43 = vadd.f32 %v1658_v10, %v467_v34  ;;  %v469_v45 = vmul.f32 %v1654_v7, %v212_v28  ;;  %v470_v46 = vmul.f32 %v1654_v7, %v213_v29  ;;  %976 = vst [vmem:[%s1684_s20 + $0xd8] sm:$0xff] %v720_v38  ;;  %v234_v28 = vld [vmem:[%s1641_s26 + $0x1b8] sm:$0xff]  ;;  %v235_v33 = vld [vmem:[%s1641_s26 + $0x1c0] sm:$0xff] }
  0x5a   : > { %977 = vst [vmem:[%s1684_s20 + $0xe0] sm:$0xff] %v721_v39  ;;  %978 = vst [vmem:[%s1684_s20 + $0xe8] sm:$0xff] %v722_v40  ;;  %v471_v48 = vmul.f32 %v1654_v7, %v214_v30  ;;  %v472_v49 = vmul.f32 %v1654_v7, %v215_v35  ;;  %v473_v50 = vmul.f32 %v1654_v7, %v216_v36  ;;  %v236_v38 = vld [vmem:[%s1641_s26 + $0x1c8] sm:$0xff]  ;;  %v237_v39 = vld [vmem:[%s1641_s26 + $0x1d0] sm:$0xff] }
  0x5b   : > { %979 = vst [vmem:[%s1684_s20 + $0xf0] sm:$0xff] %v723_v41  ;;  %v474_v51 = vmul.f32 %v1654_v7, %v217_v37  ;;  %980 = vst [vmem:[%s1684_s20 + $0xf8] sm:$0xff] %v724_v43  ;;  %v725_v55 = vadd.f32 %v1658_v10, %v468_v44  ;;  %v726_v56 = vadd.f32 %v1658_v10, %v469_v45  ;;  %v238_v40 = vld [vmem:[%s1641_s26 + $0x1d8] sm:$0xff]  ;;  %v239_v45 = vld [vmem:[%s1641_s26 + $0x1e0] sm:$0xff] }
  0x5c   : > { %v727_v57 = vadd.f32 %v1658_v10, %v470_v46  ;;  %v475_v58 = vmul.f32 %v1654_v7, %v218_v42  ;;  %v728_v62 = vadd.f32 %v1658_v10, %v471_v48  ;;  %v729_v63 = vadd.f32 %v1658_v10, %v472_v49  ;;  %v240_v46 = vld [vmem:[%s1641_s26 + $0x1e8] sm:$0xff] }
  0x5d   : > { %v730_v0 = vadd.f32 %v1658_v10, %v473_v50  ;;  %v731_v1 = vadd.f32 %v1658_v10, %v474_v51  ;;  %981 = vst [vmem:[%s1684_s20 + $0x100] sm:$0xff] %v725_v55  ;;  %982 = vst [vmem:[%s1684_s20 + $0x108] sm:$0xff] %v726_v56  ;;  %v476_v4 = vmul.f32 %v1654_v7, %v219_v47  ;;  %v241_v47 = vld [vmem:[%s1641_s26 + $0x1f0] sm:$0xff] }
  0x5e   : > { %983 = vst [vmem:[%s1684_s20 + $0x110] sm:$0xff] %v727_v57  ;;  %v732_v3 = vadd.f32 %v1658_v10, %v475_v58  ;;  %v477_v5 = vmul.f32 %v1654_v7, %v220_v52  ;;  %v478_v6 = vmul.f32 %v1654_v7, %v221_v53  ;;  %984 = vst [vmem:[%s1684_s20 + $0x118] sm:$0xff] %v728_v62  ;;  %v242_v52 = vld [vmem:[%s1641_s26 + $0x1f8] sm:$0xff]  ;;  %v243_v57 = vld [vmem:[%s1641_s26 + $0x200] sm:$0xff] }
  0x5f   : > { %985 = vst [vmem:[%s1684_s20 + $0x120] sm:$0xff] %v729_v63  ;;  %986 = vst [vmem:[%s1684_s20 + $0x128] sm:$0xff] %v730_v0  ;;  %v479_v9 = vmul.f32 %v1654_v7, %v222_v54  ;;  %v480_v11 = vmul.f32 %v1654_v7, %v223_v59  ;;  %v481_v12 = vmul.f32 %v1654_v7, %v224_v60  ;;  %v244_v62 = vld [vmem:[%s1641_s26 + $0x208] sm:$0xff]  ;;  %v245_v63 = vld [vmem:[%s1641_s26 + $0x210] sm:$0xff] }
  0x60   : > { %987 = vst [vmem:[%s1684_s20 + $0x130] sm:$0xff] %v731_v1  ;;  %v482_v13 = vmul.f32 %v1654_v7, %v225_v61  ;;  %988 = vst [vmem:[%s1684_s20 + $0x138] sm:$0xff] %v732_v3  ;;  %v733_v17 = vadd.f32 %v1658_v10, %v476_v4  ;;  %v734_v18 = vadd.f32 %v1658_v10, %v477_v5  ;;  %v246_v0 = vld [vmem:[%s1641_s26 + $0x218] sm:$0xff]  ;;  %v247_v5 = vld [vmem:[%s1641_s26 + $0x220] sm:$0xff] }
  0x61   : > { %v735_v19 = vadd.f32 %v1658_v10, %v478_v6  ;;  %v483_v20 = vmul.f32 %v1654_v7, %v226_v2  ;;  %v736_v24 = vadd.f32 %v1658_v10, %v479_v9  ;;  %v737_v25 = vadd.f32 %v1658_v10, %v480_v11  ;;  %v248_v6 = vld [vmem:[%s1641_s26 + $0x228] sm:$0xff] }
  0x62   : > { %v738_v26 = vadd.f32 %v1658_v10, %v481_v12  ;;  %v739_v27 = vadd.f32 %v1658_v10, %v482_v13  ;;  %989 = vst [vmem:[%s1684_s20 + $0x140] sm:$0xff] %v733_v17  ;;  %990 = vst [vmem:[%s1684_s20 + $0x148] sm:$0xff] %v734_v18  ;;  %v484_v30 = vmul.f32 %v1654_v7, %v227_v8  ;;  %v249_v8 = vld [vmem:[%s1641_s26 + $0x230] sm:$0xff] }
  0x63   : > { %991 = vst [vmem:[%s1684_s20 + $0x150] sm:$0xff] %v735_v19  ;;  %v740_v29 = vadd.f32 %v1658_v10, %v483_v20  ;;  %v485_v31 = vmul.f32 %v1654_v7, %v228_v14  ;;  %v486_v32 = vmul.f32 %v1654_v7, %v229_v15  ;;  %992 = vst [vmem:[%s1684_s20 + $0x158] sm:$0xff] %v736_v24  ;;  %v250_v14 = vld [vmem:[%s1641_s26 + $0x238] sm:$0xff]  ;;  %v251_v19 = vld [vmem:[%s1641_s26 + $0x240] sm:$0xff] }
  0x64   : > { %993 = vst [vmem:[%s1684_s20 + $0x160] sm:$0xff] %v737_v25  ;;  %994 = vst [vmem:[%s1684_s20 + $0x168] sm:$0xff] %v738_v26  ;;  %v487_v34 = vmul.f32 %v1654_v7, %v230_v16  ;;  %v488_v35 = vmul.f32 %v1654_v7, %v231_v21  ;;  %v489_v36 = vmul.f32 %v1654_v7, %v232_v22  ;;  %v252_v24 = vld [vmem:[%s1641_s26 + $0x248] sm:$0xff]  ;;  %v253_v25 = vld [vmem:[%s1641_s26 + $0x250] sm:$0xff] }
  0x65   : > { %995 = vst [vmem:[%s1684_s20 + $0x170] sm:$0xff] %v739_v27  ;;  %v490_v37 = vmul.f32 %v1654_v7, %v233_v23  ;;  %996 = vst [vmem:[%s1684_s20 + $0x178] sm:$0xff] %v740_v29  ;;  %v741_v41 = vadd.f32 %v1658_v10, %v484_v30  ;;  %v742_v42 = vadd.f32 %v1658_v10, %v485_v31  ;;  %v254_v26 = vld [vmem:[%s1641_s26 + $0x258] sm:$0xff]  ;;  %v255_v31 = vld [vmem:[%s1641_s26 + $0x260] sm:$0xff] }
  0x66   : > { %v743_v43 = vadd.f32 %v1658_v10, %v486_v32  ;;  %v491_v44 = vmul.f32 %v1654_v7, %v234_v28  ;;  %v744_v48 = vadd.f32 %v1658_v10, %v487_v34  ;;  %v745_v49 = vadd.f32 %v1658_v10, %v488_v35  ;;  %v256_v32 = vld [vmem:[%s1641_s26 + $0x268] sm:$0xff] }
  0x67   : > { %v746_v50 = vadd.f32 %v1658_v10, %v489_v36  ;;  %v747_v51 = vadd.f32 %v1658_v10, %v490_v37  ;;  %997 = vst [vmem:[%s1684_s20 + $0x180] sm:$0xff] %v741_v41  ;;  %998 = vst [vmem:[%s1684_s20 + $0x188] sm:$0xff] %v742_v42  ;;  %v492_v54 = vmul.f32 %v1654_v7, %v235_v33  ;;  %v257_v33 = vld [vmem:[%s1641_s26 + $0x270] sm:$0xff] }
  0x68   : > { %999 = vst [vmem:[%s1684_s20 + $0x190] sm:$0xff] %v743_v43  ;;  %v748_v53 = vadd.f32 %v1658_v10, %v491_v44  ;;  %v493_v55 = vmul.f32 %v1654_v7, %v236_v38  ;;  %v494_v56 = vmul.f32 %v1654_v7, %v237_v39  ;;  %1000 = vst [vmem:[%s1684_s20 + $0x198] sm:$0xff] %v744_v48  ;;  %v258_v38 = vld [vmem:[%s1641_s26 + $0x278] sm:$0xff]  ;;  %v259_v43 = vld [vmem:[%s1641_s26 + $0x280] sm:$0xff] }
  0x69   : > { %1001 = vst [vmem:[%s1684_s20 + $0x1a0] sm:$0xff] %v745_v49  ;;  %1002 = vst [vmem:[%s1684_s20 + $0x1a8] sm:$0xff] %v746_v50  ;;  %v495_v58 = vmul.f32 %v1654_v7, %v238_v40  ;;  %v496_v59 = vmul.f32 %v1654_v7, %v239_v45  ;;  %v497_v60 = vmul.f32 %v1654_v7, %v240_v46  ;;  %v260_v48 = vld [vmem:[%s1641_s26 + $0x288] sm:$0xff]  ;;  %v261_v49 = vld [vmem:[%s1641_s26 + $0x290] sm:$0xff] }
  0x6a   : > { %1003 = vst [vmem:[%s1684_s20 + $0x1b0] sm:$0xff] %v747_v51  ;;  %v498_v61 = vmul.f32 %v1654_v7, %v241_v47  ;;  %1004 = vst [vmem:[%s1684_s20 + $0x1b8] sm:$0xff] %v748_v53  ;;  %v749_v1 = vadd.f32 %v1658_v10, %v492_v54  ;;  %v750_v2 = vadd.f32 %v1658_v10, %v493_v55  ;;  %v262_v50 = vld [vmem:[%s1641_s26 + $0x298] sm:$0xff]  ;;  %v263_v55 = vld [vmem:[%s1641_s26 + $0x2a0] sm:$0xff] }
  0x6b   : > { %v751_v3 = vadd.f32 %v1658_v10, %v494_v56  ;;  %v499_v4 = vmul.f32 %v1654_v7, %v242_v52  ;;  %v752_v9 = vadd.f32 %v1658_v10, %v495_v58  ;;  %v753_v11 = vadd.f32 %v1658_v10, %v496_v59  ;;  %v264_v56 = vld [vmem:[%s1641_s26 + $0x2a8] sm:$0xff] }
  0x6c   : > { %v754_v12 = vadd.f32 %v1658_v10, %v497_v60  ;;  %v755_v13 = vadd.f32 %v1658_v10, %v498_v61  ;;  %1005 = vst [vmem:[%s1684_s20 + $0x1c0] sm:$0xff] %v749_v1  ;;  %1006 = vst [vmem:[%s1684_s20 + $0x1c8] sm:$0xff] %v750_v2  ;;  %v500_v16 = vmul.f32 %v1654_v7, %v243_v57  ;;  %v265_v57 = vld [vmem:[%s1641_s26 + $0x2b0] sm:$0xff] }
  0x6d   : > { %1007 = vst [vmem:[%s1684_s20 + $0x1d0] sm:$0xff] %v751_v3  ;;  %v756_v15 = vadd.f32 %v1658_v10, %v499_v4  ;;  %v501_v17 = vmul.f32 %v1654_v7, %v244_v62  ;;  %v502_v18 = vmul.f32 %v1654_v7, %v245_v63  ;;  %1008 = vst [vmem:[%s1684_s20 + $0x1d8] sm:$0xff] %v752_v9  ;;  %v266_v62 = vld [vmem:[%s1641_s26 + $0x2b8] sm:$0xff]  ;;  %v267_v3 = vld [vmem:[%s1641_s26 + $0x2c0] sm:$0xff] }
  0x6e   : > { %1009 = vst [vmem:[%s1684_s20 + $0x1e0] sm:$0xff] %v753_v11  ;;  %1010 = vst [vmem:[%s1684_s20 + $0x1e8] sm:$0xff] %v754_v12  ;;  %v503_v20 = vmul.f32 %v1654_v7, %v246_v0  ;;  %v504_v21 = vmul.f32 %v1654_v7, %v247_v5  ;;  %v505_v22 = vmul.f32 %v1654_v7, %v248_v6  ;;  %v268_v9 = vld [vmem:[%s1641_s26 + $0x2c8] sm:$0xff]  ;;  %v269_v11 = vld [vmem:[%s1641_s26 + $0x2d0] sm:$0xff] }
  0x6f   : > { %1011 = vst [vmem:[%s1684_s20 + $0x1f0] sm:$0xff] %v755_v13  ;;  %v506_v23 = vmul.f32 %v1654_v7, %v249_v8  ;;  %1012 = vst [vmem:[%s1684_s20 + $0x1f8] sm:$0xff] %v756_v15  ;;  %v757_v27 = vadd.f32 %v1658_v10, %v500_v16  ;;  %v758_v28 = vadd.f32 %v1658_v10, %v501_v17  ;;  %v270_v12 = vld [vmem:[%s1641_s26 + $0x2d8] sm:$0xff]  ;;  %v271_v17 = vld [vmem:[%s1641_s26 + $0x2e0] sm:$0xff] }
  0x70   : > { %v759_v29 = vadd.f32 %v1658_v10, %v502_v18  ;;  %v507_v30 = vmul.f32 %v1654_v7, %v250_v14  ;;  %v760_v34 = vadd.f32 %v1658_v10, %v503_v20  ;;  %v761_v35 = vadd.f32 %v1658_v10, %v504_v21  ;;  %v272_v18 = vld [vmem:[%s1641_s26 + $0x2e8] sm:$0xff] }
  0x71   : > { %v762_v36 = vadd.f32 %v1658_v10, %v505_v22  ;;  %v763_v37 = vadd.f32 %v1658_v10, %v506_v23  ;;  %1013 = vst [vmem:[%s1684_s20 + $0x200] sm:$0xff] %v757_v27  ;;  %1014 = vst [vmem:[%s1684_s20 + $0x208] sm:$0xff] %v758_v28  ;;  %v508_v40 = vmul.f32 %v1654_v7, %v251_v19  ;;  %v273_v19 = vld [vmem:[%s1641_s26 + $0x2f0] sm:$0xff] }
  0x72   : > { %1015 = vst [vmem:[%s1684_s20 + $0x210] sm:$0xff] %v759_v29  ;;  %v764_v39 = vadd.f32 %v1658_v10, %v507_v30  ;;  %v509_v41 = vmul.f32 %v1654_v7, %v252_v24  ;;  %v510_v42 = vmul.f32 %v1654_v7, %v253_v25  ;;  %1016 = vst [vmem:[%s1684_s20 + $0x218] sm:$0xff] %v760_v34  ;;  %v274_v24 = vld [vmem:[%s1641_s26 + $0x2f8] sm:$0xff]  ;;  %v275_v29 = vld [vmem:[%s1641_s26 + $0x300] sm:$0xff] }
  0x73   : > { %1017 = vst [vmem:[%s1684_s20 + $0x220] sm:$0xff] %v761_v35  ;;  %1018 = vst [vmem:[%s1684_s20 + $0x228] sm:$0xff] %v762_v36  ;;  %v511_v44 = vmul.f32 %v1654_v7, %v254_v26  ;;  %v512_v45 = vmul.f32 %v1654_v7, %v255_v31  ;;  %v513_v46 = vmul.f32 %v1654_v7, %v256_v32  ;;  %v276_v34 = vld [vmem:[%s1641_s26 + $0x308] sm:$0xff]  ;;  %v277_v35 = vld [vmem:[%s1641_s26 + $0x310] sm:$0xff] }
  0x74   : > { %1019 = vst [vmem:[%s1684_s20 + $0x230] sm:$0xff] %v763_v37  ;;  %v514_v47 = vmul.f32 %v1654_v7, %v257_v33  ;;  %1020 = vst [vmem:[%s1684_s20 + $0x238] sm:$0xff] %v764_v39  ;;  %v765_v51 = vadd.f32 %v1658_v10, %v508_v40  ;;  %v766_v52 = vadd.f32 %v1658_v10, %v509_v41  ;;  %v278_v36 = vld [vmem:[%s1641_s26 + $0x318] sm:$0xff]  ;;  %v279_v41 = vld [vmem:[%s1641_s26 + $0x320] sm:$0xff] }
  0x75   : > { %v767_v53 = vadd.f32 %v1658_v10, %v510_v42  ;;  %v515_v54 = vmul.f32 %v1654_v7, %v258_v38  ;;  %v768_v58 = vadd.f32 %v1658_v10, %v511_v44  ;;  %v769_v59 = vadd.f32 %v1658_v10, %v512_v45  ;;  %v280_v42 = vld [vmem:[%s1641_s26 + $0x328] sm:$0xff] }
  0x76   : > { %v770_v60 = vadd.f32 %v1658_v10, %v513_v46  ;;  %v771_v61 = vadd.f32 %v1658_v10, %v514_v47  ;;  %1021 = vst [vmem:[%s1684_s20 + $0x240] sm:$0xff] %v765_v51  ;;  %1022 = vst [vmem:[%s1684_s20 + $0x248] sm:$0xff] %v766_v52  ;;  %v516_v0 = vmul.f32 %v1654_v7, %v259_v43  ;;  %v281_v43 = vld [vmem:[%s1641_s26 + $0x330] sm:$0xff] }
  0x77   : > { %1023 = vst [vmem:[%s1684_s20 + $0x250] sm:$0xff] %v767_v53  ;;  %v772_v63 = vadd.f32 %v1658_v10, %v515_v54  ;;  %v517_v1 = vmul.f32 %v1654_v7, %v260_v48  ;;  %v518_v2 = vmul.f32 %v1654_v7, %v261_v49  ;;  %1024 = vst [vmem:[%s1684_s20 + $0x258] sm:$0xff] %v768_v58  ;;  %v282_v48 = vld [vmem:[%s1641_s26 + $0x338] sm:$0xff]  ;;  %v283_v53 = vld [vmem:[%s1641_s26 + $0x340] sm:$0xff] }
  0x78   : > { %1025 = vst [vmem:[%s1684_s20 + $0x260] sm:$0xff] %v769_v59  ;;  %1026 = vst [vmem:[%s1684_s20 + $0x268] sm:$0xff] %v770_v60  ;;  %v519_v4 = vmul.f32 %v1654_v7, %v262_v50  ;;  %v520_v5 = vmul.f32 %v1654_v7, %v263_v55  ;;  %v521_v6 = vmul.f32 %v1654_v7, %v264_v56  ;;  %v284_v58 = vld [vmem:[%s1641_s26 + $0x348] sm:$0xff]  ;;  %v285_v59 = vld [vmem:[%s1641_s26 + $0x350] sm:$0xff] }
  0x79   : > { %1027 = vst [vmem:[%s1684_s20 + $0x270] sm:$0xff] %v771_v61  ;;  %v522_v8 = vmul.f32 %v1654_v7, %v265_v57  ;;  %1028 = vst [vmem:[%s1684_s20 + $0x278] sm:$0xff] %v772_v63  ;;  %v773_v13 = vadd.f32 %v1658_v10, %v516_v0  ;;  %v774_v14 = vadd.f32 %v1658_v10, %v517_v1  ;;  %v286_v60 = vld [vmem:[%s1641_s26 + $0x358] sm:$0xff]  ;;  %v287_v1 = vld [vmem:[%s1641_s26 + $0x360] sm:$0xff] }
  0x7a   : > { %v775_v15 = vadd.f32 %v1658_v10, %v518_v2  ;;  %v523_v16 = vmul.f32 %v1654_v7, %v266_v62  ;;  %v776_v20 = vadd.f32 %v1658_v10, %v519_v4  ;;  %v777_v21 = vadd.f32 %v1658_v10, %v520_v5  ;;  %v288_v2 = vld [vmem:[%s1641_s26 + $0x368] sm:$0xff] }
  0x7b   : > { %v778_v22 = vadd.f32 %v1658_v10, %v521_v6  ;;  %v779_v23 = vadd.f32 %v1658_v10, %v522_v8  ;;  %1029 = vst [vmem:[%s1684_s20 + $0x280] sm:$0xff] %v773_v13  ;;  %1030 = vst [vmem:[%s1684_s20 + $0x288] sm:$0xff] %v774_v14  ;;  %v524_v26 = vmul.f32 %v1654_v7, %v267_v3  ;;  %v289_v3 = vld [vmem:[%s1641_s26 + $0x370] sm:$0xff] }
  0x7c   : > { %1031 = vst [vmem:[%s1684_s20 + $0x290] sm:$0xff] %v775_v15  ;;  %v780_v25 = vadd.f32 %v1658_v10, %v523_v16  ;;  %v525_v27 = vmul.f32 %v1654_v7, %v268_v9  ;;  %v526_v28 = vmul.f32 %v1654_v7, %v269_v11  ;;  %1032 = vst [vmem:[%s1684_s20 + $0x298] sm:$0xff] %v776_v20  ;;  %v290_v9 = vld [vmem:[%s1641_s26 + $0x378] sm:$0xff]  ;;  %v291_v15 = vld [vmem:[%s1641_s26 + $0x380] sm:$0xff] }
  0x7d   : > { %1033 = vst [vmem:[%s1684_s20 + $0x2a0] sm:$0xff] %v777_v21  ;;  %1034 = vst [vmem:[%s1684_s20 + $0x2a8] sm:$0xff] %v778_v22  ;;  %v527_v30 = vmul.f32 %v1654_v7, %v270_v12  ;;  %v528_v31 = vmul.f32 %v1654_v7, %v271_v17  ;;  %v529_v32 = vmul.f32 %v1654_v7, %v272_v18  ;;  %v292_v20 = vld [vmem:[%s1641_s26 + $0x388] sm:$0xff]  ;;  %v293_v21 = vld [vmem:[%s1641_s26 + $0x390] sm:$0xff] }
  0x7e   : > { %1035 = vst [vmem:[%s1684_s20 + $0x2b0] sm:$0xff] %v779_v23  ;;  %v530_v33 = vmul.f32 %v1654_v7, %v273_v19  ;;  %1036 = vst [vmem:[%s1684_s20 + $0x2b8] sm:$0xff] %v780_v25  ;;  %v781_v37 = vadd.f32 %v1658_v10, %v524_v26  ;;  %v782_v38 = vadd.f32 %v1658_v10, %v525_v27  ;;  %v294_v22 = vld [vmem:[%s1641_s26 + $0x398] sm:$0xff]  ;;  %v295_v27 = vld [vmem:[%s1641_s26 + $0x3a0] sm:$0xff] }
  0x7f   : > { %v783_v39 = vadd.f32 %v1658_v10, %v526_v28  ;;  %v531_v40 = vmul.f32 %v1654_v7, %v274_v24  ;;  %v784_v44 = vadd.f32 %v1658_v10, %v527_v30  ;;  %v785_v45 = vadd.f32 %v1658_v10, %v528_v31  ;;  %v296_v28 = vld [vmem:[%s1641_s26 + $0x3a8] sm:$0xff] }
  0x80   : > { %v786_v46 = vadd.f32 %v1658_v10, %v529_v32  ;;  %v787_v47 = vadd.f32 %v1658_v10, %v530_v33  ;;  %1037 = vst [vmem:[%s1684_s20 + $0x2c0] sm:$0xff] %v781_v37  ;;  %1038 = vst [vmem:[%s1684_s20 + $0x2c8] sm:$0xff] %v782_v38  ;;  %v532_v50 = vmul.f32 %v1654_v7, %v275_v29  ;;  %v297_v29 = vld [vmem:[%s1641_s26 + $0x3b0] sm:$0xff] }
  0x81   : > { %1039 = vst [vmem:[%s1684_s20 + $0x2d0] sm:$0xff] %v783_v39  ;;  %v788_v49 = vadd.f32 %v1658_v10, %v531_v40  ;;  %v533_v51 = vmul.f32 %v1654_v7, %v276_v34  ;;  %v534_v52 = vmul.f32 %v1654_v7, %v277_v35  ;;  %1040 = vst [vmem:[%s1684_s20 + $0x2d8] sm:$0xff] %v784_v44  ;;  %v298_v34 = vld [vmem:[%s1641_s26 + $0x3b8] sm:$0xff]  ;;  %v299_v39 = vld [vmem:[%s1641_s26 + $0x3c0] sm:$0xff] }
  0x82   : > { %1041 = vst [vmem:[%s1684_s20 + $0x2e0] sm:$0xff] %v785_v45  ;;  %1042 = vst [vmem:[%s1684_s20 + $0x2e8] sm:$0xff] %v786_v46  ;;  %v535_v54 = vmul.f32 %v1654_v7, %v278_v36  ;;  %v536_v55 = vmul.f32 %v1654_v7, %v279_v41  ;;  %v537_v56 = vmul.f32 %v1654_v7, %v280_v42  ;;  %v300_v44 = vld [vmem:[%s1641_s26 + $0x3c8] sm:$0xff]  ;;  %v301_v45 = vld [vmem:[%s1641_s26 + $0x3d0] sm:$0xff] }
  0x83   : > { %1043 = vst [vmem:[%s1684_s20 + $0x2f0] sm:$0xff] %v787_v47  ;;  %v538_v57 = vmul.f32 %v1654_v7, %v281_v43  ;;  %1044 = vst [vmem:[%s1684_s20 + $0x2f8] sm:$0xff] %v788_v49  ;;  %v789_v61 = vadd.f32 %v1658_v10, %v532_v50  ;;  %v790_v62 = vadd.f32 %v1658_v10, %v533_v51  ;;  %v302_v46 = vld [vmem:[%s1641_s26 + $0x3d8] sm:$0xff]  ;;  %v303_v51 = vld [vmem:[%s1641_s26 + $0x3e0] sm:$0xff] }
  0x84   : > { %v791_v63 = vadd.f32 %v1658_v10, %v534_v52  ;;  %v539_v0 = vmul.f32 %v1654_v7, %v282_v48  ;;  %v792_v4 = vadd.f32 %v1658_v10, %v535_v54  ;;  %v793_v5 = vadd.f32 %v1658_v10, %v536_v55  ;;  %v304_v52 = vld [vmem:[%s1641_s26 + $0x3e8] sm:$0xff] }
  0x85   : > { %v794_v6 = vadd.f32 %v1658_v10, %v537_v56  ;;  %v795_v8 = vadd.f32 %v1658_v10, %v538_v57  ;;  %1045 = vst [vmem:[%s1684_s20 + $0x300] sm:$0xff] %v789_v61  ;;  %1046 = vst [vmem:[%s1684_s20 + $0x308] sm:$0xff] %v790_v62  ;;  %v540_v12 = vmul.f32 %v1654_v7, %v283_v53  ;;  %v305_v53 = vld [vmem:[%s1641_s26 + $0x3f0] sm:$0xff] }
  0x86   : > { %1047 = vst [vmem:[%s1684_s20 + $0x310] sm:$0xff] %v791_v63  ;;  %v796_v11 = vadd.f32 %v1658_v10, %v539_v0  ;;  %v541_v13 = vmul.f32 %v1654_v7, %v284_v58  ;;  %v542_v14 = vmul.f32 %v1654_v7, %v285_v59  ;;  %1048 = vst [vmem:[%s1684_s20 + $0x318] sm:$0xff] %v792_v4  ;;  %v306_v58 = vld [vmem:[%s1641_s26 + $0x3f8] sm:$0xff]  ;;  %v307_v63 = vld [vmem:[%s1641_s26 + $0x400] sm:$0xff] }
  0x87   : > { %1049 = vst [vmem:[%s1684_s20 + $0x320] sm:$0xff] %v793_v5  ;;  %1050 = vst [vmem:[%s1684_s20 + $0x328] sm:$0xff] %v794_v6  ;;  %v543_v16 = vmul.f32 %v1654_v7, %v286_v60  ;;  %v544_v17 = vmul.f32 %v1654_v7, %v287_v1  ;;  %v545_v18 = vmul.f32 %v1654_v7, %v288_v2  ;;  %v308_v4 = vld [vmem:[%s1641_s26 + $0x408] sm:$0xff]  ;;  %v309_v5 = vld [vmem:[%s1641_s26 + $0x410] sm:$0xff] }
  0x88   : > { %1051 = vst [vmem:[%s1684_s20 + $0x330] sm:$0xff] %v795_v8  ;;  %v546_v19 = vmul.f32 %v1654_v7, %v289_v3  ;;  %1052 = vst [vmem:[%s1684_s20 + $0x338] sm:$0xff] %v796_v11  ;;  %v797_v23 = vadd.f32 %v1658_v10, %v540_v12  ;;  %v798_v24 = vadd.f32 %v1658_v10, %v541_v13  ;;  %v310_v6 = vld [vmem:[%s1641_s26 + $0x418] sm:$0xff]  ;;  %v311_v13 = vld [vmem:[%s1641_s26 + $0x420] sm:$0xff] }
  0x89   : > { %v799_v25 = vadd.f32 %v1658_v10, %v542_v14  ;;  %v547_v26 = vmul.f32 %v1654_v7, %v290_v9  ;;  %v800_v30 = vadd.f32 %v1658_v10, %v543_v16  ;;  %v801_v31 = vadd.f32 %v1658_v10, %v544_v17  ;;  %v312_v14 = vld [vmem:[%s1641_s26 + $0x428] sm:$0xff] }
  0x8a   : > { %v802_v32 = vadd.f32 %v1658_v10, %v545_v18  ;;  %v803_v33 = vadd.f32 %v1658_v10, %v546_v19  ;;  %1053 = vst [vmem:[%s1684_s20 + $0x340] sm:$0xff] %v797_v23  ;;  %1054 = vst [vmem:[%s1684_s20 + $0x348] sm:$0xff] %v798_v24  ;;  %v548_v36 = vmul.f32 %v1654_v7, %v291_v15  ;;  %v313_v15 = vld [vmem:[%s1641_s26 + $0x430] sm:$0xff] }
  0x8b   : > { %1055 = vst [vmem:[%s1684_s20 + $0x350] sm:$0xff] %v799_v25  ;;  %v804_v35 = vadd.f32 %v1658_v10, %v547_v26  ;;  %v549_v37 = vmul.f32 %v1654_v7, %v292_v20  ;;  %v550_v38 = vmul.f32 %v1654_v7, %v293_v21  ;;  %1056 = vst [vmem:[%s1684_s20 + $0x358] sm:$0xff] %v800_v30  ;;  %v314_v20 = vld [vmem:[%s1641_s26 + $0x438] sm:$0xff]  ;;  %v315_v25 = vld [vmem:[%s1641_s26 + $0x440] sm:$0xff] }
  0x8c   : > { %1057 = vst [vmem:[%s1684_s20 + $0x360] sm:$0xff] %v801_v31  ;;  %1058 = vst [vmem:[%s1684_s20 + $0x368] sm:$0xff] %v802_v32  ;;  %v551_v40 = vmul.f32 %v1654_v7, %v294_v22  ;;  %v552_v41 = vmul.f32 %v1654_v7, %v295_v27  ;;  %v553_v42 = vmul.f32 %v1654_v7, %v296_v28  ;;  %v316_v30 = vld [vmem:[%s1641_s26 + $0x448] sm:$0xff]  ;;  %v317_v31 = vld [vmem:[%s1641_s26 + $0x450] sm:$0xff] }
  0x8d   : > { %1059 = vst [vmem:[%s1684_s20 + $0x370] sm:$0xff] %v803_v33  ;;  %v554_v43 = vmul.f32 %v1654_v7, %v297_v29  ;;  %1060 = vst [vmem:[%s1684_s20 + $0x378] sm:$0xff] %v804_v35  ;;  %v805_v47 = vadd.f32 %v1658_v10, %v548_v36  ;;  %v806_v48 = vadd.f32 %v1658_v10, %v549_v37  ;;  %v318_v32 = vld [vmem:[%s1641_s26 + $0x458] sm:$0xff]  ;;  %v319_v37 = vld [vmem:[%s1641_s26 + $0x460] sm:$0xff] }
  0x8e   : > { %v807_v49 = vadd.f32 %v1658_v10, %v550_v38  ;;  %v555_v50 = vmul.f32 %v1654_v7, %v298_v34  ;;  %v808_v54 = vadd.f32 %v1658_v10, %v551_v40  ;;  %v809_v55 = vadd.f32 %v1658_v10, %v552_v41  ;;  %v320_v38 = vld [vmem:[%s1641_s26 + $0x468] sm:$0xff] }
  0x8f   : > { %v810_v56 = vadd.f32 %v1658_v10, %v553_v42  ;;  %v811_v57 = vadd.f32 %v1658_v10, %v554_v43  ;;  %1061 = vst [vmem:[%s1684_s20 + $0x380] sm:$0xff] %v805_v47  ;;  %1062 = vst [vmem:[%s1684_s20 + $0x388] sm:$0xff] %v806_v48  ;;  %v556_v60 = vmul.f32 %v1654_v7, %v299_v39  ;;  %v321_v39 = vld [vmem:[%s1641_s26 + $0x470] sm:$0xff] }
  0x90   : > { %1063 = vst [vmem:[%s1684_s20 + $0x390] sm:$0xff] %v807_v49  ;;  %v812_v59 = vadd.f32 %v1658_v10, %v555_v50  ;;  %v557_v61 = vmul.f32 %v1654_v7, %v300_v44  ;;  %v558_v62 = vmul.f32 %v1654_v7, %v301_v45  ;;  %1064 = vst [vmem:[%s1684_s20 + $0x398] sm:$0xff] %v808_v54  ;;  %v322_v44 = vld [vmem:[%s1641_s26 + $0x478] sm:$0xff]  ;;  %v323_v49 = vld [vmem:[%s1641_s26 + $0x480] sm:$0xff] }
  0x91   : > { %1065 = vst [vmem:[%s1684_s20 + $0x3a0] sm:$0xff] %v809_v55  ;;  %1066 = vst [vmem:[%s1684_s20 + $0x3a8] sm:$0xff] %v810_v56  ;;  %v559_v0 = vmul.f32 %v1654_v7, %v302_v46  ;;  %v560_v1 = vmul.f32 %v1654_v7, %v303_v51  ;;  %v561_v2 = vmul.f32 %v1654_v7, %v304_v52  ;;  %v324_v54 = vld [vmem:[%s1641_s26 + $0x488] sm:$0xff]  ;;  %v325_v55 = vld [vmem:[%s1641_s26 + $0x490] sm:$0xff] }
  0x92   : > { %1067 = vst [vmem:[%s1684_s20 + $0x3b0] sm:$0xff] %v811_v57  ;;  %v562_v3 = vmul.f32 %v1654_v7, %v305_v53  ;;  %1068 = vst [vmem:[%s1684_s20 + $0x3b8] sm:$0xff] %v812_v59  ;;  %v813_v8 = vadd.f32 %v1658_v10, %v556_v60  ;;  %v814_v9 = vadd.f32 %v1658_v10, %v557_v61  ;;  %v326_v56 = vld [vmem:[%s1641_s26 + $0x498] sm:$0xff]  ;;  %v327_v61 = vld [vmem:[%s1641_s26 + $0x4a0] sm:$0xff] }
  0x93   : > { %v815_v11 = vadd.f32 %v1658_v10, %v558_v62  ;;  %v563_v12 = vmul.f32 %v1654_v7, %v306_v58  ;;  %v816_v16 = vadd.f32 %v1658_v10, %v559_v0  ;;  %v817_v17 = vadd.f32 %v1658_v10, %v560_v1  ;;  %v328_v62 = vld [vmem:[%s1641_s26 + $0x4a8] sm:$0xff] }
  0x94   : > { %v818_v18 = vadd.f32 %v1658_v10, %v561_v2  ;;  %v819_v19 = vadd.f32 %v1658_v10, %v562_v3  ;;  %1069 = vst [vmem:[%s1684_s20 + $0x3c0] sm:$0xff] %v813_v8  ;;  %1070 = vst [vmem:[%s1684_s20 + $0x3c8] sm:$0xff] %v814_v9  ;;  %v564_v22 = vmul.f32 %v1654_v7, %v307_v63  ;;  %v329_v63 = vld [vmem:[%s1641_s26 + $0x4b0] sm:$0xff] }
  0x95   : > { %1071 = vst [vmem:[%s1684_s20 + $0x3d0] sm:$0xff] %v815_v11  ;;  %v820_v21 = vadd.f32 %v1658_v10, %v563_v12  ;;  %v565_v23 = vmul.f32 %v1654_v7, %v308_v4  ;;  %v566_v24 = vmul.f32 %v1654_v7, %v309_v5  ;;  %1072 = vst [vmem:[%s1684_s20 + $0x3d8] sm:$0xff] %v816_v16  ;;  %v330_v4 = vld [vmem:[%s1641_s26 + $0x4b8] sm:$0xff]  ;;  %v331_v11 = vld [vmem:[%s1641_s26 + $0x4c0] sm:$0xff] }
  0x96   : > { %1073 = vst [vmem:[%s1684_s20 + $0x3e0] sm:$0xff] %v817_v17  ;;  %1074 = vst [vmem:[%s1684_s20 + $0x3e8] sm:$0xff] %v818_v18  ;;  %v567_v26 = vmul.f32 %v1654_v7, %v310_v6  ;;  %v568_v27 = vmul.f32 %v1654_v7, %v311_v13  ;;  %v569_v28 = vmul.f32 %v1654_v7, %v312_v14  ;;  %v332_v16 = vld [vmem:[%s1641_s26 + $0x4c8] sm:$0xff]  ;;  %v333_v17 = vld [vmem:[%s1641_s26 + $0x4d0] sm:$0xff] }
  0x97   : > { %1075 = vst [vmem:[%s1684_s20 + $0x3f0] sm:$0xff] %v819_v19  ;;  %v570_v29 = vmul.f32 %v1654_v7, %v313_v15  ;;  %1076 = vst [vmem:[%s1684_s20 + $0x3f8] sm:$0xff] %v820_v21  ;;  %v821_v33 = vadd.f32 %v1658_v10, %v564_v22  ;;  %v822_v34 = vadd.f32 %v1658_v10, %v565_v23  ;;  %v334_v18 = vld [vmem:[%s1641_s26 + $0x4d8] sm:$0xff]  ;;  %v335_v23 = vld [vmem:[%s1641_s26 + $0x4e0] sm:$0xff] }
  0x98   : > { %v823_v35 = vadd.f32 %v1658_v10, %v566_v24  ;;  %v571_v36 = vmul.f32 %v1654_v7, %v314_v20  ;;  %v824_v40 = vadd.f32 %v1658_v10, %v567_v26  ;;  %v825_v41 = vadd.f32 %v1658_v10, %v568_v27  ;;  %v336_v24 = vld [vmem:[%s1641_s26 + $0x4e8] sm:$0xff] }
  0x99   : > { %v826_v42 = vadd.f32 %v1658_v10, %v569_v28  ;;  %v827_v43 = vadd.f32 %v1658_v10, %v570_v29  ;;  %1077 = vst [vmem:[%s1684_s20 + $0x400] sm:$0xff] %v821_v33  ;;  %1078 = vst [vmem:[%s1684_s20 + $0x408] sm:$0xff] %v822_v34  ;;  %v572_v46 = vmul.f32 %v1654_v7, %v315_v25  ;;  %v337_v25 = vld [vmem:[%s1641_s26 + $0x4f0] sm:$0xff] }
  0x9a   : > { %1079 = vst [vmem:[%s1684_s20 + $0x410] sm:$0xff] %v823_v35  ;;  %v828_v45 = vadd.f32 %v1658_v10, %v571_v36  ;;  %v573_v47 = vmul.f32 %v1654_v7, %v316_v30  ;;  %v574_v48 = vmul.f32 %v1654_v7, %v317_v31  ;;  %1080 = vst [vmem:[%s1684_s20 + $0x418] sm:$0xff] %v824_v40  ;;  %v338_v30 = vld [vmem:[%s1641_s26 + $0x4f8] sm:$0xff]  ;;  %v339_v35 = vld [vmem:[%s1641_s26 + $0x500] sm:$0xff] }
  0x9b   : > { %1081 = vst [vmem:[%s1684_s20 + $0x420] sm:$0xff] %v825_v41  ;;  %1082 = vst [vmem:[%s1684_s20 + $0x428] sm:$0xff] %v826_v42  ;;  %v575_v50 = vmul.f32 %v1654_v7, %v318_v32  ;;  %v576_v51 = vmul.f32 %v1654_v7, %v319_v37  ;;  %v577_v52 = vmul.f32 %v1654_v7, %v320_v38  ;;  %v340_v40 = vld [vmem:[%s1641_s26 + $0x508] sm:$0xff]  ;;  %v341_v41 = vld [vmem:[%s1641_s26 + $0x510] sm:$0xff] }
  0x9c   : > { %1083 = vst [vmem:[%s1684_s20 + $0x430] sm:$0xff] %v827_v43  ;;  %v578_v53 = vmul.f32 %v1654_v7, %v321_v39  ;;  %1084 = vst [vmem:[%s1684_s20 + $0x438] sm:$0xff] %v828_v45  ;;  %v829_v57 = vadd.f32 %v1658_v10, %v572_v46  ;;  %v830_v58 = vadd.f32 %v1658_v10, %v573_v47  ;;  %v342_v42 = vld [vmem:[%s1641_s26 + $0x518] sm:$0xff]  ;;  %v343_v47 = vld [vmem:[%s1641_s26 + $0x520] sm:$0xff] }
  0x9d   : > { %v831_v59 = vadd.f32 %v1658_v10, %v574_v48  ;;  %v579_v60 = vmul.f32 %v1654_v7, %v322_v44  ;;  %v832_v0 = vadd.f32 %v1658_v10, %v575_v50  ;;  %v833_v1 = vadd.f32 %v1658_v10, %v576_v51  ;;  %v344_v48 = vld [vmem:[%s1641_s26 + $0x528] sm:$0xff] }
  0x9e   : > { %v834_v2 = vadd.f32 %v1658_v10, %v577_v52  ;;  %v835_v3 = vadd.f32 %v1658_v10, %v578_v53  ;;  %1085 = vst [vmem:[%s1684_s20 + $0x440] sm:$0xff] %v829_v57  ;;  %1086 = vst [vmem:[%s1684_s20 + $0x448] sm:$0xff] %v830_v58  ;;  %v580_v6 = vmul.f32 %v1654_v7, %v323_v49  ;;  %v345_v49 = vld [vmem:[%s1641_s26 + $0x530] sm:$0xff] }
  0x9f   : > { %1087 = vst [vmem:[%s1684_s20 + $0x450] sm:$0xff] %v831_v59  ;;  %v836_v5 = vadd.f32 %v1658_v10, %v579_v60  ;;  %v581_v8 = vmul.f32 %v1654_v7, %v324_v54  ;;  %v582_v9 = vmul.f32 %v1654_v7, %v325_v55  ;;  %1088 = vst [vmem:[%s1684_s20 + $0x458] sm:$0xff] %v832_v0  ;;  %v346_v54 = vld [vmem:[%s1641_s26 + $0x538] sm:$0xff]  ;;  %v347_v59 = vld [vmem:[%s1641_s26 + $0x540] sm:$0xff] }
  0xa0   : > { %1089 = vst [vmem:[%s1684_s20 + $0x460] sm:$0xff] %v833_v1  ;;  %1090 = vst [vmem:[%s1684_s20 + $0x468] sm:$0xff] %v834_v2  ;;  %v583_v12 = vmul.f32 %v1654_v7, %v326_v56  ;;  %v584_v13 = vmul.f32 %v1654_v7, %v327_v61  ;;  %v585_v14 = vmul.f32 %v1654_v7, %v328_v62  ;;  %v348_v0 = vld [vmem:[%s1641_s26 + $0x548] sm:$0xff]  ;;  %v349_v1 = vld [vmem:[%s1641_s26 + $0x550] sm:$0xff] }
  0xa1   : > { %1091 = vst [vmem:[%s1684_s20 + $0x470] sm:$0xff] %v835_v3  ;;  %v586_v15 = vmul.f32 %v1654_v7, %v329_v63  ;;  %1092 = vst [vmem:[%s1684_s20 + $0x478] sm:$0xff] %v836_v5  ;;  %v837_v19 = vadd.f32 %v1658_v10, %v580_v6  ;;  %v838_v20 = vadd.f32 %v1658_v10, %v581_v8  ;;  %v350_v2 = vld [vmem:[%s1641_s26 + $0x558] sm:$0xff]  ;;  %v351_v8 = vld [vmem:[%s1641_s26 + $0x560] sm:$0xff] }
  0xa2   : > { %v839_v21 = vadd.f32 %v1658_v10, %v582_v9  ;;  %v587_v22 = vmul.f32 %v1654_v7, %v330_v4  ;;  %v840_v26 = vadd.f32 %v1658_v10, %v583_v12  ;;  %v841_v27 = vadd.f32 %v1658_v10, %v584_v13  ;;  %v352_v9 = vld [vmem:[%s1641_s26 + $0x568] sm:$0xff] }
  0xa3   : > { %v842_v28 = vadd.f32 %v1658_v10, %v585_v14  ;;  %v843_v29 = vadd.f32 %v1658_v10, %v586_v15  ;;  %1093 = vst [vmem:[%s1684_s20 + $0x480] sm:$0xff] %v837_v19  ;;  %1094 = vst [vmem:[%s1684_s20 + $0x488] sm:$0xff] %v838_v20  ;;  %v588_v32 = vmul.f32 %v1654_v7, %v331_v11  ;;  %v353_v11 = vld [vmem:[%s1641_s26 + $0x570] sm:$0xff] }
  0xa4   : > { %1095 = vst [vmem:[%s1684_s20 + $0x490] sm:$0xff] %v839_v21  ;;  %v844_v31 = vadd.f32 %v1658_v10, %v587_v22  ;;  %v589_v33 = vmul.f32 %v1654_v7, %v332_v16  ;;  %v590_v34 = vmul.f32 %v1654_v7, %v333_v17  ;;  %1096 = vst [vmem:[%s1684_s20 + $0x498] sm:$0xff] %v840_v26  ;;  %v354_v16 = vld [vmem:[%s1641_s26 + $0x578] sm:$0xff]  ;;  %v355_v21 = vld [vmem:[%s1641_s26 + $0x580] sm:$0xff] }
  0xa5   : > { %1097 = vst [vmem:[%s1684_s20 + $0x4a0] sm:$0xff] %v841_v27  ;;  %1098 = vst [vmem:[%s1684_s20 + $0x4a8] sm:$0xff] %v842_v28  ;;  %v591_v36 = vmul.f32 %v1654_v7, %v334_v18  ;;  %v592_v37 = vmul.f32 %v1654_v7, %v335_v23  ;;  %v593_v38 = vmul.f32 %v1654_v7, %v336_v24  ;;  %v356_v26 = vld [vmem:[%s1641_s26 + $0x588] sm:$0xff]  ;;  %v357_v27 = vld [vmem:[%s1641_s26 + $0x590] sm:$0xff] }
  0xa6   : > { %1099 = vst [vmem:[%s1684_s20 + $0x4b0] sm:$0xff] %v843_v29  ;;  %v594_v39 = vmul.f32 %v1654_v7, %v337_v25  ;;  %1100 = vst [vmem:[%s1684_s20 + $0x4b8] sm:$0xff] %v844_v31  ;;  %v845_v43 = vadd.f32 %v1658_v10, %v588_v32  ;;  %v846_v44 = vadd.f32 %v1658_v10, %v589_v33  ;;  %v358_v28 = vld [vmem:[%s1641_s26 + $0x598] sm:$0xff]  ;;  %v359_v33 = vld [vmem:[%s1641_s26 + $0x5a0] sm:$0xff] }
  0xa7   : > { %v847_v45 = vadd.f32 %v1658_v10, %v590_v34  ;;  %v595_v46 = vmul.f32 %v1654_v7, %v338_v30  ;;  %v848_v50 = vadd.f32 %v1658_v10, %v591_v36  ;;  %v849_v51 = vadd.f32 %v1658_v10, %v592_v37  ;;  %v360_v34 = vld [vmem:[%s1641_s26 + $0x5a8] sm:$0xff] }
  0xa8   : > { %v850_v52 = vadd.f32 %v1658_v10, %v593_v38  ;;  %v851_v53 = vadd.f32 %v1658_v10, %v594_v39  ;;  %1101 = vst [vmem:[%s1684_s20 + $0x4c0] sm:$0xff] %v845_v43  ;;  %1102 = vst [vmem:[%s1684_s20 + $0x4c8] sm:$0xff] %v846_v44  ;;  %v596_v56 = vmul.f32 %v1654_v7, %v339_v35  ;;  %v361_v35 = vld [vmem:[%s1641_s26 + $0x5b0] sm:$0xff] }
  0xa9   : > { %1103 = vst [vmem:[%s1684_s20 + $0x4d0] sm:$0xff] %v847_v45  ;;  %v852_v55 = vadd.f32 %v1658_v10, %v595_v46  ;;  %v597_v57 = vmul.f32 %v1654_v7, %v340_v40  ;;  %v598_v58 = vmul.f32 %v1654_v7, %v341_v41  ;;  %1104 = vst [vmem:[%s1684_s20 + $0x4d8] sm:$0xff] %v848_v50  ;;  %v362_v40 = vld [vmem:[%s1641_s26 + $0x5b8] sm:$0xff]  ;;  %v363_v45 = vld [vmem:[%s1641_s26 + $0x5c0] sm:$0xff] }
  0xaa   : > { %1105 = vst [vmem:[%s1684_s20 + $0x4e0] sm:$0xff] %v849_v51  ;;  %1106 = vst [vmem:[%s1684_s20 + $0x4e8] sm:$0xff] %v850_v52  ;;  %v599_v60 = vmul.f32 %v1654_v7, %v342_v42  ;;  %v600_v61 = vmul.f32 %v1654_v7, %v343_v47  ;;  %v601_v62 = vmul.f32 %v1654_v7, %v344_v48  ;;  %v364_v50 = vld [vmem:[%s1641_s26 + $0x5c8] sm:$0xff]  ;;  %v365_v51 = vld [vmem:[%s1641_s26 + $0x5d0] sm:$0xff] }
  0xab   : > { %1107 = vst [vmem:[%s1684_s20 + $0x4f0] sm:$0xff] %v851_v53  ;;  %v602_v63 = vmul.f32 %v1654_v7, %v345_v49  ;;  %1108 = vst [vmem:[%s1684_s20 + $0x4f8] sm:$0xff] %v852_v55  ;;  %v853_v3 = vadd.f32 %v1658_v10, %v596_v56  ;;  %v854_v4 = vadd.f32 %v1658_v10, %v597_v57  ;;  %v366_v52 = vld [vmem:[%s1641_s26 + $0x5d8] sm:$0xff]  ;;  %v367_v57 = vld [vmem:[%s1641_s26 + $0x5e0] sm:$0xff] }
  0xac   : > { %v855_v5 = vadd.f32 %v1658_v10, %v598_v58  ;;  %v603_v6 = vmul.f32 %v1654_v7, %v346_v54  ;;  %v856_v12 = vadd.f32 %v1658_v10, %v599_v60  ;;  %v857_v13 = vadd.f32 %v1658_v10, %v600_v61  ;;  %v368_v58 = vld [vmem:[%s1641_s26 + $0x5e8] sm:$0xff] }
  0xad   : > { %v858_v14 = vadd.f32 %v1658_v10, %v601_v62  ;;  %v859_v15 = vadd.f32 %v1658_v10, %v602_v63  ;;  %1109 = vst [vmem:[%s1684_s20 + $0x500] sm:$0xff] %v853_v3  ;;  %1110 = vst [vmem:[%s1684_s20 + $0x508] sm:$0xff] %v854_v4  ;;  %v604_v18 = vmul.f32 %v1654_v7, %v347_v59  ;;  %v369_v59 = vld [vmem:[%s1641_s26 + $0x5f0] sm:$0xff] }
  0xae   : > { %1111 = vst [vmem:[%s1684_s20 + $0x510] sm:$0xff] %v855_v5  ;;  %v860_v17 = vadd.f32 %v1658_v10, %v603_v6  ;;  %v605_v19 = vmul.f32 %v1654_v7, %v348_v0  ;;  %v606_v20 = vmul.f32 %v1654_v7, %v349_v1  ;;  %1112 = vst [vmem:[%s1684_s20 + $0x518] sm:$0xff] %v856_v12  ;;  %v370_v0 = vld [vmem:[%s1641_s26 + $0x5f8] sm:$0xff]  ;;  %v371_v5 = vld [vmem:[%s1641_s26 + $0x600] sm:$0xff] }
  0xaf   : > { %1113 = vst [vmem:[%s1684_s20 + $0x520] sm:$0xff] %v857_v13  ;;  %1114 = vst [vmem:[%s1684_s20 + $0x528] sm:$0xff] %v858_v14  ;;  %v607_v22 = vmul.f32 %v1654_v7, %v350_v2  ;;  %v608_v23 = vmul.f32 %v1654_v7, %v351_v8  ;;  %v609_v24 = vmul.f32 %v1654_v7, %v352_v9  ;;  %v372_v12 = vld [vmem:[%s1641_s26 + $0x608] sm:$0xff]  ;;  %v373_v13 = vld [vmem:[%s1641_s26 + $0x610] sm:$0xff] }
  0xb0   : > { %1115 = vst [vmem:[%s1684_s20 + $0x530] sm:$0xff] %v859_v15  ;;  %v610_v25 = vmul.f32 %v1654_v7, %v353_v11  ;;  %1116 = vst [vmem:[%s1684_s20 + $0x538] sm:$0xff] %v860_v17  ;;  %v861_v29 = vadd.f32 %v1658_v10, %v604_v18  ;;  %v862_v30 = vadd.f32 %v1658_v10, %v605_v19  ;;  %v374_v14 = vld [vmem:[%s1641_s26 + $0x618] sm:$0xff]  ;;  %v375_v19 = vld [vmem:[%s1641_s26 + $0x620] sm:$0xff] }
  0xb1   : > { %v863_v31 = vadd.f32 %v1658_v10, %v606_v20  ;;  %v611_v32 = vmul.f32 %v1654_v7, %v354_v16  ;;  %v864_v36 = vadd.f32 %v1658_v10, %v607_v22  ;;  %v865_v37 = vadd.f32 %v1658_v10, %v608_v23  ;;  %v376_v20 = vld [vmem:[%s1641_s26 + $0x628] sm:$0xff] }
  0xb2   : > { %v866_v38 = vadd.f32 %v1658_v10, %v609_v24  ;;  %v867_v39 = vadd.f32 %v1658_v10, %v610_v25  ;;  %1117 = vst [vmem:[%s1684_s20 + $0x540] sm:$0xff] %v861_v29  ;;  %1118 = vst [vmem:[%s1684_s20 + $0x548] sm:$0xff] %v862_v30  ;;  %v612_v42 = vmul.f32 %v1654_v7, %v355_v21  ;;  %v377_v21 = vld [vmem:[%s1641_s26 + $0x630] sm:$0xff] }
  0xb3   : > { %1119 = vst [vmem:[%s1684_s20 + $0x550] sm:$0xff] %v863_v31  ;;  %v868_v41 = vadd.f32 %v1658_v10, %v611_v32  ;;  %v613_v43 = vmul.f32 %v1654_v7, %v356_v26  ;;  %v614_v44 = vmul.f32 %v1654_v7, %v357_v27  ;;  %1120 = vst [vmem:[%s1684_s20 + $0x558] sm:$0xff] %v864_v36  ;;  %v378_v26 = vld [vmem:[%s1641_s26 + $0x638] sm:$0xff]  ;;  %v379_v31 = vld [vmem:[%s1641_s26 + $0x640] sm:$0xff] }
  0xb4   : > { %1121 = vst [vmem:[%s1684_s20 + $0x560] sm:$0xff] %v865_v37  ;;  %1122 = vst [vmem:[%s1684_s20 + $0x568] sm:$0xff] %v866_v38  ;;  %v615_v46 = vmul.f32 %v1654_v7, %v358_v28  ;;  %v616_v47 = vmul.f32 %v1654_v7, %v359_v33  ;;  %v617_v48 = vmul.f32 %v1654_v7, %v360_v34  ;;  %v380_v36 = vld [vmem:[%s1641_s26 + $0x648] sm:$0xff]  ;;  %v381_v37 = vld [vmem:[%s1641_s26 + $0x650] sm:$0xff] }
  0xb5   : > { %1123 = vst [vmem:[%s1684_s20 + $0x570] sm:$0xff] %v867_v39  ;;  %v618_v49 = vmul.f32 %v1654_v7, %v361_v35  ;;  %1124 = vst [vmem:[%s1684_s20 + $0x578] sm:$0xff] %v868_v41  ;;  %v869_v53 = vadd.f32 %v1658_v10, %v612_v42  ;;  %v870_v54 = vadd.f32 %v1658_v10, %v613_v43  ;;  %v382_v38 = vld [vmem:[%s1641_s26 + $0x658] sm:$0xff]  ;;  %v383_v43 = vld [vmem:[%s1641_s26 + $0x660] sm:$0xff] }
  0xb6   : > { %v871_v55 = vadd.f32 %v1658_v10, %v614_v44  ;;  %v619_v56 = vmul.f32 %v1654_v7, %v362_v40  ;;  %v872_v60 = vadd.f32 %v1658_v10, %v615_v46  ;;  %v873_v61 = vadd.f32 %v1658_v10, %v616_v47  ;;  %v384_v44 = vld [vmem:[%s1641_s26 + $0x668] sm:$0xff] }
  0xb7   : > { %v874_v62 = vadd.f32 %v1658_v10, %v617_v48  ;;  %v875_v63 = vadd.f32 %v1658_v10, %v618_v49  ;;  %1125 = vst [vmem:[%s1684_s20 + $0x580] sm:$0xff] %v869_v53  ;;  %1126 = vst [vmem:[%s1684_s20 + $0x588] sm:$0xff] %v870_v54  ;;  %v620_v2 = vmul.f32 %v1654_v7, %v363_v45  ;;  %v385_v45 = vld [vmem:[%s1641_s26 + $0x670] sm:$0xff] }
  0xb8   : > { %1127 = vst [vmem:[%s1684_s20 + $0x590] sm:$0xff] %v871_v55  ;;  %v876_v1 = vadd.f32 %v1658_v10, %v619_v56  ;;  %v621_v3 = vmul.f32 %v1654_v7, %v364_v50  ;;  %v622_v4 = vmul.f32 %v1654_v7, %v365_v51  ;;  %1128 = vst [vmem:[%s1684_s20 + $0x598] sm:$0xff] %v872_v60  ;;  %v386_v50 = vld [vmem:[%s1641_s26 + $0x678] sm:$0xff]  ;;  %v387_v55 = vld [vmem:[%s1641_s26 + $0x680] sm:$0xff] }
  0xb9   : > { %1129 = vst [vmem:[%s1684_s20 + $0x5a0] sm:$0xff] %v873_v61  ;;  %1130 = vst [vmem:[%s1684_s20 + $0x5a8] sm:$0xff] %v874_v62  ;;  %v623_v6 = vmul.f32 %v1654_v7, %v366_v52  ;;  %v624_v8 = vmul.f32 %v1654_v7, %v367_v57  ;;  %v625_v9 = vmul.f32 %v1654_v7, %v368_v58  ;;  %v388_v60 = vld [vmem:[%s1641_s26 + $0x688] sm:$0xff]  ;;  %v389_v61 = vld [vmem:[%s1641_s26 + $0x690] sm:$0xff] }
  0xba   : > { %1131 = vst [vmem:[%s1684_s20 + $0x5b0] sm:$0xff] %v875_v63  ;;  %v626_v11 = vmul.f32 %v1654_v7, %v369_v59  ;;  %1132 = vst [vmem:[%s1684_s20 + $0x5b8] sm:$0xff] %v876_v1  ;;  %v877_v15 = vadd.f32 %v1658_v10, %v620_v2  ;;  %v878_v16 = vadd.f32 %v1658_v10, %v621_v3  ;;  %v390_v62 = vld [vmem:[%s1641_s26 + $0x698] sm:$0xff]  ;;  %v391_v3 = vld [vmem:[%s1641_s26 + $0x6a0] sm:$0xff] }
  0xbb   : > { %v879_v17 = vadd.f32 %v1658_v10, %v622_v4  ;;  %v627_v18 = vmul.f32 %v1654_v7, %v370_v0  ;;  %v880_v22 = vadd.f32 %v1658_v10, %v623_v6  ;;  %v881_v23 = vadd.f32 %v1658_v10, %v624_v8  ;;  %v392_v4 = vld [vmem:[%s1641_s26 + $0x6a8] sm:$0xff] }
  0xbc   : > { %v882_v24 = vadd.f32 %v1658_v10, %v625_v9  ;;  %v883_v25 = vadd.f32 %v1658_v10, %v626_v11  ;;  %1133 = vst [vmem:[%s1684_s20 + $0x5c0] sm:$0xff] %v877_v15  ;;  %1134 = vst [vmem:[%s1684_s20 + $0x5c8] sm:$0xff] %v878_v16  ;;  %v628_v28 = vmul.f32 %v1654_v7, %v371_v5  ;;  %v393_v5 = vld [vmem:[%s1641_s26 + $0x6b0] sm:$0xff] }
  0xbd   : > { %1135 = vst [vmem:[%s1684_s20 + $0x5d0] sm:$0xff] %v879_v17  ;;  %v884_v27 = vadd.f32 %v1658_v10, %v627_v18  ;;  %v629_v29 = vmul.f32 %v1654_v7, %v372_v12  ;;  %v630_v30 = vmul.f32 %v1654_v7, %v373_v13  ;;  %1136 = vst [vmem:[%s1684_s20 + $0x5d8] sm:$0xff] %v880_v22  ;;  %v394_v12 = vld [vmem:[%s1641_s26 + $0x6b8] sm:$0xff]  ;;  %v395_v17 = vld [vmem:[%s1641_s26 + $0x6c0] sm:$0xff] }
  0xbe   : > { %1137 = vst [vmem:[%s1684_s20 + $0x5e0] sm:$0xff] %v881_v23  ;;  %1138 = vst [vmem:[%s1684_s20 + $0x5e8] sm:$0xff] %v882_v24  ;;  %v631_v32 = vmul.f32 %v1654_v7, %v374_v14  ;;  %v632_v33 = vmul.f32 %v1654_v7, %v375_v19  ;;  %v633_v34 = vmul.f32 %v1654_v7, %v376_v20  ;;  %v396_v22 = vld [vmem:[%s1641_s26 + $0x6c8] sm:$0xff]  ;;  %v397_v23 = vld [vmem:[%s1641_s26 + $0x6d0] sm:$0xff] }
  0xbf   : > { %1139 = vst [vmem:[%s1684_s20 + $0x5f0] sm:$0xff] %v883_v25  ;;  %v634_v35 = vmul.f32 %v1654_v7, %v377_v21  ;;  %1140 = vst [vmem:[%s1684_s20 + $0x5f8] sm:$0xff] %v884_v27  ;;  %v885_v39 = vadd.f32 %v1658_v10, %v628_v28  ;;  %v886_v40 = vadd.f32 %v1658_v10, %v629_v29  ;;  %v398_v24 = vld [vmem:[%s1641_s26 + $0x6d8] sm:$0xff]  ;;  %v399_v29 = vld [vmem:[%s1641_s26 + $0x6e0] sm:$0xff] }
  0xc0   : > { %v887_v41 = vadd.f32 %v1658_v10, %v630_v30  ;;  %v635_v42 = vmul.f32 %v1654_v7, %v378_v26  ;;  %v888_v46 = vadd.f32 %v1658_v10, %v631_v32  ;;  %v889_v47 = vadd.f32 %v1658_v10, %v632_v33  ;;  %v400_v30 = vld [vmem:[%s1641_s26 + $0x6e8] sm:$0xff] }
  0xc1   : > { %v890_v48 = vadd.f32 %v1658_v10, %v633_v34  ;;  %v891_v49 = vadd.f32 %v1658_v10, %v634_v35  ;;  %1141 = vst [vmem:[%s1684_s20 + $0x600] sm:$0xff] %v885_v39  ;;  %1142 = vst [vmem:[%s1684_s20 + $0x608] sm:$0xff] %v886_v40  ;;  %v636_v52 = vmul.f32 %v1654_v7, %v379_v31  ;;  %v401_v31 = vld [vmem:[%s1641_s26 + $0x6f0] sm:$0xff] }
  0xc2   : > { %1143 = vst [vmem:[%s1684_s20 + $0x610] sm:$0xff] %v887_v41  ;;  %v892_v51 = vadd.f32 %v1658_v10, %v635_v42  ;;  %v637_v53 = vmul.f32 %v1654_v7, %v380_v36  ;;  %v638_v54 = vmul.f32 %v1654_v7, %v381_v37  ;;  %1144 = vst [vmem:[%s1684_s20 + $0x618] sm:$0xff] %v888_v46  ;;  %v402_v36 = vld [vmem:[%s1641_s26 + $0x6f8] sm:$0xff]  ;;  %v403_v41 = vld [vmem:[%s1641_s26 + $0x700] sm:$0xff] }
  0xc3   : > { %1145 = vst [vmem:[%s1684_s20 + $0x620] sm:$0xff] %v889_v47  ;;  %1146 = vst [vmem:[%s1684_s20 + $0x628] sm:$0xff] %v890_v48  ;;  %v639_v56 = vmul.f32 %v1654_v7, %v382_v38  ;;  %v640_v57 = vmul.f32 %v1654_v7, %v383_v43  ;;  %v641_v58 = vmul.f32 %v1654_v7, %v384_v44  ;;  %v404_v46 = vld [vmem:[%s1641_s26 + $0x708] sm:$0xff]  ;;  %v405_v47 = vld [vmem:[%s1641_s26 + $0x710] sm:$0xff] }
  0xc4   : > { %1147 = vst [vmem:[%s1684_s20 + $0x630] sm:$0xff] %v891_v49  ;;  %v642_v59 = vmul.f32 %v1654_v7, %v385_v45  ;;  %1148 = vst [vmem:[%s1684_s20 + $0x638] sm:$0xff] %v892_v51  ;;  %v893_v63 = vadd.f32 %v1658_v10, %v636_v52  ;;  %v894_v0 = vadd.f32 %v1658_v10, %v637_v53  ;;  %v406_v48 = vld [vmem:[%s1641_s26 + $0x718] sm:$0xff]  ;;  %v407_v53 = vld [vmem:[%s1641_s26 + $0x720] sm:$0xff] }
  0xc5   : > { %v895_v1 = vadd.f32 %v1658_v10, %v638_v54  ;;  %v643_v2 = vmul.f32 %v1654_v7, %v386_v50  ;;  %v896_v6 = vadd.f32 %v1658_v10, %v639_v56  ;;  %v897_v8 = vadd.f32 %v1658_v10, %v640_v57  ;;  %v408_v54 = vld [vmem:[%s1641_s26 + $0x728] sm:$0xff] }
  0xc6   : > { %v898_v9 = vadd.f32 %v1658_v10, %v641_v58  ;;  %v899_v11 = vadd.f32 %v1658_v10, %v642_v59  ;;  %1149 = vst [vmem:[%s1684_s20 + $0x640] sm:$0xff] %v893_v63  ;;  %1150 = vst [vmem:[%s1684_s20 + $0x648] sm:$0xff] %v894_v0  ;;  %v644_v14 = vmul.f32 %v1654_v7, %v387_v55  ;;  %v409_v55 = vld [vmem:[%s1641_s26 + $0x730] sm:$0xff] }
  0xc7   : > { %1151 = vst [vmem:[%s1684_s20 + $0x650] sm:$0xff] %v895_v1  ;;  %v900_v13 = vadd.f32 %v1658_v10, %v643_v2  ;;  %v645_v15 = vmul.f32 %v1654_v7, %v388_v60  ;;  %v646_v16 = vmul.f32 %v1654_v7, %v389_v61  ;;  %1152 = vst [vmem:[%s1684_s20 + $0x658] sm:$0xff] %v896_v6  ;;  %v410_v60 = vld [vmem:[%s1641_s26 + $0x738] sm:$0xff]  ;;  %v411_v1 = vld [vmem:[%s1641_s26 + $0x740] sm:$0xff] }
  0xc8   : > { %1153 = vst [vmem:[%s1684_s20 + $0x660] sm:$0xff] %v897_v8  ;;  %1154 = vst [vmem:[%s1684_s20 + $0x668] sm:$0xff] %v898_v9  ;;  %v647_v18 = vmul.f32 %v1654_v7, %v390_v62  ;;  %v648_v19 = vmul.f32 %v1654_v7, %v391_v3  ;;  %v649_v20 = vmul.f32 %v1654_v7, %v392_v4  ;;  %v412_v6 = vld [vmem:[%s1641_s26 + $0x748] sm:$0xff]  ;;  %v413_v8 = vld [vmem:[%s1641_s26 + $0x750] sm:$0xff] }
  0xc9   : > { %1155 = vst [vmem:[%s1684_s20 + $0x670] sm:$0xff] %v899_v11  ;;  %v650_v21 = vmul.f32 %v1654_v7, %v393_v5  ;;  %1156 = vst [vmem:[%s1684_s20 + $0x678] sm:$0xff] %v900_v13  ;;  %v901_v25 = vadd.f32 %v1658_v10, %v644_v14  ;;  %v902_v26 = vadd.f32 %v1658_v10, %v645_v15  ;;  %v414_v9 = vld [vmem:[%s1641_s26 + $0x758] sm:$0xff]  ;;  %v415_v15 = vld [vmem:[%s1641_s26 + $0x760] sm:$0xff] }
  0xca   : > { %v903_v27 = vadd.f32 %v1658_v10, %v646_v16  ;;  %v651_v28 = vmul.f32 %v1654_v7, %v394_v12  ;;  %v904_v32 = vadd.f32 %v1658_v10, %v647_v18  ;;  %v905_v33 = vadd.f32 %v1658_v10, %v648_v19  ;;  %v416_v16 = vld [vmem:[%s1641_s26 + $0x768] sm:$0xff] }
  0xcb   : > { %v906_v34 = vadd.f32 %v1658_v10, %v649_v20  ;;  %v907_v35 = vadd.f32 %v1658_v10, %v650_v21  ;;  %1157 = vst [vmem:[%s1684_s20 + $0x680] sm:$0xff] %v901_v25  ;;  %1158 = vst [vmem:[%s1684_s20 + $0x688] sm:$0xff] %v902_v26  ;;  %v652_v38 = vmul.f32 %v1654_v7, %v395_v17  ;;  %v417_v17 = vld [vmem:[%s1641_s26 + $0x770] sm:$0xff] }
  0xcc   : > { %1159 = vst [vmem:[%s1684_s20 + $0x690] sm:$0xff] %v903_v27  ;;  %v908_v37 = vadd.f32 %v1658_v10, %v651_v28  ;;  %v653_v39 = vmul.f32 %v1654_v7, %v396_v22  ;;  %v654_v40 = vmul.f32 %v1654_v7, %v397_v23  ;;  %1160 = vst [vmem:[%s1684_s20 + $0x698] sm:$0xff] %v904_v32  ;;  %v418_v22 = vld [vmem:[%s1641_s26 + $0x778] sm:$0xff]  ;;  %v419_v27 = vld [vmem:[%s1641_s26 + $0x780] sm:$0xff] }
  0xcd   : > { %1161 = vst [vmem:[%s1684_s20 + $0x6a0] sm:$0xff] %v905_v33  ;;  %1162 = vst [vmem:[%s1684_s20 + $0x6a8] sm:$0xff] %v906_v34  ;;  %v655_v42 = vmul.f32 %v1654_v7, %v398_v24  ;;  %v656_v43 = vmul.f32 %v1654_v7, %v399_v29  ;;  %v657_v44 = vmul.f32 %v1654_v7, %v400_v30  ;;  %v420_v32 = vld [vmem:[%s1641_s26 + $0x788] sm:$0xff]  ;;  %v421_v33 = vld [vmem:[%s1641_s26 + $0x790] sm:$0xff] }
  0xce   : > { %1163 = vst [vmem:[%s1684_s20 + $0x6b0] sm:$0xff] %v907_v35  ;;  %v658_v45 = vmul.f32 %v1654_v7, %v401_v31  ;;  %1164 = vst [vmem:[%s1684_s20 + $0x6b8] sm:$0xff] %v908_v37  ;;  %v909_v49 = vadd.f32 %v1658_v10, %v652_v38  ;;  %v910_v50 = vadd.f32 %v1658_v10, %v653_v39  ;;  %v422_v34 = vld [vmem:[%s1641_s26 + $0x798] sm:$0xff]  ;;  %v423_v39 = vld [vmem:[%s1641_s26 + $0x7a0] sm:$0xff] }
  0xcf   : > { %v911_v51 = vadd.f32 %v1658_v10, %v654_v40  ;;  %v659_v52 = vmul.f32 %v1654_v7, %v402_v36  ;;  %v912_v56 = vadd.f32 %v1658_v10, %v655_v42  ;;  %v913_v57 = vadd.f32 %v1658_v10, %v656_v43  ;;  %v424_v40 = vld [vmem:[%s1641_s26 + $0x7a8] sm:$0xff] }
  0xd0   : > { %v914_v58 = vadd.f32 %v1658_v10, %v657_v44  ;;  %v915_v59 = vadd.f32 %v1658_v10, %v658_v45  ;;  %1165 = vst [vmem:[%s1684_s20 + $0x6c0] sm:$0xff] %v909_v49  ;;  %1166 = vst [vmem:[%s1684_s20 + $0x6c8] sm:$0xff] %v910_v50  ;;  %v660_v62 = vmul.f32 %v1654_v7, %v403_v41  ;;  %v425_v41 = vld [vmem:[%s1641_s26 + $0x7b0] sm:$0xff] }
  0xd1   : > { %1167 = vst [vmem:[%s1684_s20 + $0x6d0] sm:$0xff] %v911_v51  ;;  %v916_v61 = vadd.f32 %v1658_v10, %v659_v52  ;;  %v661_v63 = vmul.f32 %v1654_v7, %v404_v46  ;;  %v662_v0 = vmul.f32 %v1654_v7, %v405_v47  ;;  %1168 = vst [vmem:[%s1684_s20 + $0x6d8] sm:$0xff] %v912_v56  ;;  %v426_v46 = vld [vmem:[%s1641_s26 + $0x7b8] sm:$0xff]  ;;  %v427_v51 = vld [vmem:[%s1641_s26 + $0x7c0] sm:$0xff] }
  0xd2   : > { %1169 = vst [vmem:[%s1684_s20 + $0x6e0] sm:$0xff] %v913_v57  ;;  %1170 = vst [vmem:[%s1684_s20 + $0x6e8] sm:$0xff] %v914_v58  ;;  %v663_v2 = vmul.f32 %v1654_v7, %v406_v48  ;;  %v664_v3 = vmul.f32 %v1654_v7, %v407_v53  ;;  %v665_v4 = vmul.f32 %v1654_v7, %v408_v54  ;;  %v428_v56 = vld [vmem:[%s1641_s26 + $0x7c8] sm:$0xff]  ;;  %v429_v57 = vld [vmem:[%s1641_s26 + $0x7d0] sm:$0xff] }
  0xd3   : > { %1171 = vst [vmem:[%s1684_s20 + $0x6f0] sm:$0xff] %v915_v59  ;;  %v666_v5 = vmul.f32 %v1654_v7, %v409_v55  ;;  %1172 = vst [vmem:[%s1684_s20 + $0x6f8] sm:$0xff] %v916_v61  ;;  %v917_v11 = vadd.f32 %v1658_v10, %v660_v62  ;;  %v918_v12 = vadd.f32 %v1658_v10, %v661_v63  ;;  %v430_v58 = vld [vmem:[%s1641_s26 + $0x7d8] sm:$0xff]  ;;  %v431_v63 = vld [vmem:[%s1641_s26 + $0x7e0] sm:$0xff] }
  0xd4   : > { %v919_v13 = vadd.f32 %v1658_v10, %v662_v0  ;;  %v667_v14 = vmul.f32 %v1654_v7, %v410_v60  ;;  %v920_v18 = vadd.f32 %v1658_v10, %v663_v2  ;;  %v921_v19 = vadd.f32 %v1658_v10, %v664_v3  ;;  %v432_v0 = vld [vmem:[%s1641_s26 + $0x7e8] sm:$0xff] }
  0xd5   : > { %v922_v20 = vadd.f32 %v1658_v10, %v665_v4  ;;  %v923_v21 = vadd.f32 %v1658_v10, %v666_v5  ;;  %1173 = vst [vmem:[%s1684_s20 + $0x700] sm:$0xff] %v917_v11  ;;  %1174 = vst [vmem:[%s1684_s20 + $0x708] sm:$0xff] %v918_v12  ;;  %v668_v24 = vmul.f32 %v1654_v7, %v411_v1  ;;  %v433_v1 = vld [vmem:[%s1641_s26 + $0x7f0] sm:$0xff] }
  0xd6   : > { %1175 = vst [vmem:[%s1684_s20 + $0x710] sm:$0xff] %v919_v13  ;;  %v924_v23 = vadd.f32 %v1658_v10, %v667_v14  ;;  %v669_v25 = vmul.f32 %v1654_v7, %v412_v6  ;;  %v670_v26 = vmul.f32 %v1654_v7, %v413_v8  ;;  %1176 = vst [vmem:[%s1684_s20 + $0x718] sm:$0xff] %v920_v18  ;;  %v434_v6 = vld [vmem:[%s1641_s26 + $0x7f8] sm:$0xff] }
  0xd7   : > { %1177 = vst [vmem:[%s1684_s20 + $0x720] sm:$0xff] %v921_v19  ;;  %1178 = vst [vmem:[%s1684_s20 + $0x728] sm:$0xff] %v922_v20  ;;  %v671_v28 = vmul.f32 %v1654_v7, %v414_v9  ;;  %v672_v29 = vmul.f32 %v1654_v7, %v415_v15  ;;  %v673_v30 = vmul.f32 %v1654_v7, %v416_v16 }
  0xd8   : > { %1179 = vst [vmem:[%s1684_s20 + $0x730] sm:$0xff] %v923_v21  ;;  %v674_v31 = vmul.f32 %v1654_v7, %v417_v17  ;;  %1180 = vst [vmem:[%s1684_s20 + $0x738] sm:$0xff] %v924_v23  ;;  %v925_v35 = vadd.f32 %v1658_v10, %v668_v24  ;;  %v926_v36 = vadd.f32 %v1658_v10, %v669_v25 }
  0xd9   : > { %v927_v37 = vadd.f32 %v1658_v10, %v670_v26  ;;  %v675_v38 = vmul.f32 %v1654_v7, %v418_v22  ;;  %v928_v42 = vadd.f32 %v1658_v10, %v671_v28  ;;  %v929_v43 = vadd.f32 %v1658_v10, %v672_v29 }
  0xda   : > { %v930_v44 = vadd.f32 %v1658_v10, %v673_v30  ;;  %v931_v45 = vadd.f32 %v1658_v10, %v674_v31  ;;  %1181 = vst [vmem:[%s1684_s20 + $0x740] sm:$0xff] %v925_v35  ;;  %1182 = vst [vmem:[%s1684_s20 + $0x748] sm:$0xff] %v926_v36  ;;  %v676_v48 = vmul.f32 %v1654_v7, %v419_v27 }
  0xdb   : > { %1183 = vst [vmem:[%s1684_s20 + $0x750] sm:$0xff] %v927_v37  ;;  %v932_v47 = vadd.f32 %v1658_v10, %v675_v38  ;;  %v677_v49 = vmul.f32 %v1654_v7, %v420_v32  ;;  %v678_v50 = vmul.f32 %v1654_v7, %v421_v33  ;;  %1184 = vst [vmem:[%s1684_s20 + $0x758] sm:$0xff] %v928_v42 }
  0xdc   : > { %1185 = vst [vmem:[%s1684_s20 + $0x760] sm:$0xff] %v929_v43  ;;  %1186 = vst [vmem:[%s1684_s20 + $0x768] sm:$0xff] %v930_v44  ;;  %v679_v52 = vmul.f32 %v1654_v7, %v422_v34  ;;  %v680_v53 = vmul.f32 %v1654_v7, %v423_v39  ;;  %v681_v54 = vmul.f32 %v1654_v7, %v424_v40 }
  0xdd   : > { %1187 = vst [vmem:[%s1684_s20 + $0x770] sm:$0xff] %v931_v45  ;;  %v682_v55 = vmul.f32 %v1654_v7, %v425_v41  ;;  %1188 = vst [vmem:[%s1684_s20 + $0x778] sm:$0xff] %v932_v47  ;;  %v933_v59 = vadd.f32 %v1658_v10, %v676_v48  ;;  %v934_v60 = vadd.f32 %v1658_v10, %v677_v49 }
  0xde   : > { %v935_v61 = vadd.f32 %v1658_v10, %v678_v50  ;;  %v683_v62 = vmul.f32 %v1654_v7, %v426_v46  ;;  %v936_v2 = vadd.f32 %v1658_v10, %v679_v52  ;;  %v937_v3 = vadd.f32 %v1658_v10, %v680_v53 }
  0xdf   : > { %v938_v4 = vadd.f32 %v1658_v10, %v681_v54  ;;  %v939_v5 = vadd.f32 %v1658_v10, %v682_v55  ;;  %1189 = vst [vmem:[%s1684_s20 + $0x780] sm:$0xff] %v933_v59  ;;  %1190 = vst [vmem:[%s1684_s20 + $0x788] sm:$0xff] %v934_v60  ;;  %v684_v9 = vmul.f32 %v1654_v7, %v427_v51 }
  0xe0   : > { %1191 = vst [vmem:[%s1684_s20 + $0x790] sm:$0xff] %v935_v61  ;;  %v940_v8 = vadd.f32 %v1658_v10, %v683_v62  ;;  %v685_v11 = vmul.f32 %v1654_v7, %v428_v56  ;;  %v686_v12 = vmul.f32 %v1654_v7, %v429_v57  ;;  %1192 = vst [vmem:[%s1684_s20 + $0x798] sm:$0xff] %v936_v2 }
  0xe1   : > { %1193 = vst [vmem:[%s1684_s20 + $0x7a0] sm:$0xff] %v937_v3  ;;  %1194 = vst [vmem:[%s1684_s20 + $0x7a8] sm:$0xff] %v938_v4  ;;  %v687_v13 = vmul.f32 %v1654_v7, %v430_v58  ;;  %v688_v14 = vmul.f32 %v1654_v7, %v431_v63  ;;  %v689_v15 = vmul.f32 %v1654_v7, %v432_v0 }
  0xe2   : > { %1195 = vst [vmem:[%s1684_s20 + $0x7b0] sm:$0xff] %v939_v5  ;;  %v690_v16 = vmul.f32 %v1654_v7, %v433_v1  ;;  %1196 = vst [vmem:[%s1684_s20 + $0x7b8] sm:$0xff] %v940_v8  ;;  %v941_v17 = vadd.f32 %v1658_v10, %v684_v9  ;;  %v942_v18 = vadd.f32 %v1658_v10, %v685_v11 }
  0xe3   : > { %v943_v19 = vadd.f32 %v1658_v10, %v686_v12  ;;  %v691_v20 = vmul.f32 %v1654_v7, %v434_v6  ;;  %v944_v21 = vadd.f32 %v1658_v10, %v687_v13  ;;  %v945_v22 = vadd.f32 %v1658_v10, %v688_v14 }
  0xe4   : > { %v946_v23 = vadd.f32 %v1658_v10, %v689_v15  ;;  %v947_v24 = vadd.f32 %v1658_v10, %v690_v16  ;;  %1197 = vst [vmem:[%s1684_s20 + $0x7c0] sm:$0xff] %v941_v17  ;;  %1198 = vst [vmem:[%s1684_s20 + $0x7c8] sm:$0xff] %v942_v18 }
  0xe5   : > { %1199 = vst [vmem:[%s1684_s20 + $0x7d0] sm:$0xff] %v943_v19  ;;  %v948_v7 = vadd.f32 %v1658_v10, %v691_v20  ;;  %1200 = vst [vmem:[%s1684_s20 + $0x7d8] sm:$0xff] %v944_v21 }
  0xe6   : > { %1201 = vst [vmem:[%s1684_s20 + $0x7e0] sm:$0xff] %v945_v22  ;;  %1202 = vst [vmem:[%s1684_s20 + $0x7e8] sm:$0xff] %v946_v23 }
  0xe7   : > { %1203 = vst [vmem:[%s1684_s20 + $0x7f0] sm:$0xff] %v947_v24  ;;  %1204 = vst [vmem:[%s1684_s20 + $0x7f8] sm:$0xff] %v948_v7 }
  0xe8   : > { %1441 = shalt.err (!%p1438_p2)
}
  0xe9   : > { %s1442_s30 = scalar_lea.hbm %s2675_s19, 32768  ;;  %s1446_s14 = scalar_lea.hbm %s2730_s2, 131072 }
  0xea   : > { %p1443_p3 = scmp.ne.s32.totalorder %s2675_s19, %s1442_s30  ;;  %p1447_p4 = scmp.lt.s32.totalorder %s2675_s19, %s2730_s2 }
  0xeb   : > { %p1448_p6 = scmp.lt.s32.totalorder %s1446_s14, %s1442_s30 }
  0xec   : > { %p1444_p7 = pnand %p1443_p3, %p2745_p13 }
  0xed   : > { %p1449_p11 = por %p1448_p6, %p1447_p4 }
  0xee   : > { %p1445_p5 = pneg %p1444_p7 }
  0xf0   : > { %p1450_p12 = pnand %p1449_p11, %p1445_p5 }
  0xf2   : > { %1453 = shalt.err (!%p1450_p12)
}
  0xf3   : > { %s1503_s23 = smov 1024   ;;  %s1504_s5 = smov 64  }
  0xf4   : > { %1334 = dma.vmem_to_hbm [thread:$0]  (%p2745_p13), %s2677_s8, 32768, %s2675_s19, %s1206_s25, %s1503_s23, %s1503_s23, %s1504_s5  }
  0xf5 PF: > { %p1351_p0 = scmp.ge.s32.totalorder %s1496_s12, 2  ;;  %s1235_s20 = sand.u32 1, %s1484_s9  }
  0xf6   : > { %p2746_p8 = scmp.ne.s32.totalorder %s2738_s22, 0  ;;  %s1236_s7 = scalar_lea.sflag [#allocation4], %s1235_s20 }
  0xf8   : > { %p1345_p9 = pnand %p1351_p0, %p2746_p8 }
  0xfa   : > { %p1346_p10 = pneg %p1345_p9 }
  0xfc   : > { %1479 = dma.done.wait (%p1346_p10), %s1236_s7, 32768  }
  0xfd   : > { %1481 = vsyncadd (%p1346_p10), %s1236_s7, 4294934528  ;;  %p16_p1 = scmp.ge.s32.totalorder %s1545_s15, 6   ;;  %s2747_s9 = smov %s1488_s10 }
  0xfe   : > { %s2748_s10 = smov %s1492_s11  ;;  %s2749_s11 = smov %s1557_s18 }
  0xff   : > { %s2750_s12 = smov %s1545_s15  ;;  %18 = sbr.rel (!%p16_p1) target bundleno = 6 (0x6), region = 78 }
 0x104   :  { %1241 = vsyncpa [#allocation3], 1 }
 0x105   :  { %1243 = vsyncpa [#allocation3 + $0x1], 1 }
 0x106   :  { %1244 = vsyncpa [#allocation4], 1 }
 0x107   :  { %1246 = vsyncpa [#allocation4 + $0x1], 1 }
 0x108   :  { %1247 = vsyncpa [#allocation5], 1 }
 0x109   :  { %1249 = vsyncpa [#allocation5 + $0x1], 1 }

</bundles_post_ra>
